<compile_context>
chip_gen: v7x
topology: tpu7x:2x2x1
jax: 0.10.0
libtpu: 0.0.40
codegen_flags: <defaults>
</compile_context>

<pallas_src>
import jax
import jax.numpy as jnp
from jax import lax
from jax.experimental import pallas as pl
from jax.experimental.pallas import tpu as pltpu


def _sigmoid(x):
    # single EUP tanh instead of an exp + Newton-reciprocal chain
    return 0.5 * jnp.tanh(0.5 * x) + 0.5


# ---------------------------------------------------------------------------
# Fused CBAM kernel.  Per sample (PyTorch-native layout, no transposes):
#   x          : (C, HW)   channels in sublanes, flattened spatial in lanes
#   w1, w2     : (Cr, C), (C, Cr)   shared channel-MLP weights (1x1 convs)
#   wavg, wmax : (HW, HW) bf16      pre-transposed dense 7x7-conv matrices
#                                   (1/C of the channel mean folded into wavg)
# ---------------------------------------------------------------------------
def _cbam_kernel(x_ref, w1_ref, w2_ref, wavg_ref, wmax_ref, o_ref):
    nb, C, HW = x_ref.shape
    ones_c = jnp.ones((1, C), jnp.float32)            # hoisted out of the loop

    for b in range(nb):    # static; nb == 1 on dual-TC grids, nb == N otherwise
        x = x_ref[b]                                   # (C, HW) f32

        # ---------------- channel attention --------------------------------
        avg = jnp.mean(x, axis=1, keepdims=True)       # (C, 1) exact f32 reduce
        mx = jnp.max(x, axis=1, keepdims=True)         # (C, 1)
        # merged [avg | max] operand for ONE MLP pass (concat-free lane select)
        lane = lax.broadcasted_iota(jnp.int32, (C, 2), 1)
        stats = jnp.where(lane == 0, avg, mx)          # (C, 2)
        h = jnp.maximum(
            jnp.dot(w1_ref[...], stats, preferred_element_type=jnp.float32),
            0.0)                                       # (Cr, 2)
        logit = jnp.dot(w2_ref[...], h,
                        preferred_element_type=jnp.float32)        # (C, 2)
        ca = _sigmoid(logit[:, 0:1] + logit[:, 1:2])   # (C, 1)
        y = x * ca                                     # (C, HW) lane-broadcast

        # ---------------- spatial attention ---------------------------------
        # channel-mean on the (idle) MXU -> lane-dense (1, HW) row; the 1/C is
        # folded into wavg_ref, so a plain channel-sum is enough here.
        c_sum = jnp.dot(ones_c, y, preferred_element_type=jnp.float32)  # (1, HW)
        c_max = jnp.max(y, axis=0, keepdims=True)                        # (1, HW)
        # 7x7 conv == two lane-dense GEMMs against the pre-transposed matrices
        sa_logit = (
            jnp.dot(c_sum.astype(wavg_ref.dtype), wavg_ref[...],
                    preferred_element_type=jnp.float32)
            + jnp.dot(c_max.astype(wmax_ref.dtype), wmax_ref[...],
                      preferred_element_type=jnp.float32))               # (1, HW)
        sa = _sigmoid(sa_logit)

        o_ref[b] = (y * sa).astype(o_ref.dtype)        # lane-dense store


# ---------------------------------------------------------------------------
# One-time weight preprocessing (call OUTSIDE the jitted forward).
# Folds Conv2d(2 -> 1, k=7, padding=3, bias=False) into two dense,
# pre-transposed (HW, HW) matrices:
#   conv(cat[mean_c(y), max_c(y)])  ==  sum_c(y) @ wavg_t  +  max_c(y) @ wmax_t
# with wt[c, i*W+j, h*W+w] = K[c, ky, kx],  i = h+ky-3, j = w+kx-3 (in bounds),
# and the 1/C of the channel mean folded into wavg_t.  Stored in bf16 (the MXU
# accumulates in f32 on all generations).
# ---------------------------------------------------------------------------
def fold_spatial_conv(sa_w, H, W, C):
    HW = H * W
    # Dense folding is O((HW)^2) bytes; guard VMEM (v7x has 64 MiB physical).
    # TODO(synk): shift-based (pltpu.roll) conv fallback for large feature maps.
    assert 2 * HW * HW * 2 <= 8 * 1024 * 1024, (
        "feature map too large for the dense folded-conv path")
    k = sa_w.astype(jnp.float32)                       # (2, 7, 7) [chan, ky, kx]
    sh = jnp.stack([jnp.eye(H, H, k=ky - 3, dtype=jnp.float32) for ky in range(7)])
    sw = jnp.stack([jnp.eye(W, W, k=kx - 3, dtype=jnp.float32) for kx in range(7)])
    wt = jnp.einsum('cyx,yhi,xwj->cijhw', k, sh, sw).reshape(2, HW, HW)
    wavg_t = (wt[0] * (1.0 / float(C))).astype(jnp.bfloat16)
    wmax_t = wt[1].astype(jnp.bfloat16)
    return wavg_t, wmax_t


def _tensorcores_per_chip():
    """Best effort: v7x exposes 2 TensorCores per chip, v5e/v6e have 1."""
    try:
        kind = jax.devices()[0].device_kind.lower()
    except Exception:
        return 1
    return 2 if ("v7" in kind or "7x" in kind) else 1


def cbam_forward(x_nchw, ca_w1, ca_w2, wavg_t, wmax_t):
    """CBAM forward.  x_nchw: (N, C, H, W); ca_w1: (C//r, C); ca_w2: (C, C//r);
    wavg_t / wmax_t: matrices from fold_spatial_conv (precomputed once)."""
    N, C, H, W = x_nchw.shape
    HW = H * W
    Cr = ca_w1.shape[0]

    # Free reshape only — NO NCHW<->NHWC transpose; kernel works in (C, HW).
    x = x_nchw.reshape(N, C, HW).astype(jnp.float32)

    # Generation-aware batching: one sample per grid step on dual-TC chips so
    # the "parallel" batch axis splits across cores; whole batch in one block
    # on single-TC v5e/v6e (no per-step pipeline overhead).
    nb = 1 if (_tensorcores_per_chip() >= 2 and N > 1) else N
    grid = (N // nb,)

    cost = pl.CostEstimate(
        flops=int(N * (4 * HW * HW + 2 * C * HW + 8 * C * Cr + 6 * C * HW)),
        transcendentals=int(N * (C + HW)),
        bytes_accessed=int(8 * N * C * HW + 4 * HW * HW + 8 * C * Cr))

    out = pl.pallas_call(
        _cbam_kernel,
        grid=grid,
        in_specs=[
            pl.BlockSpec((nb, C, HW), lambda n: (n, 0, 0)),
            # weight specs have constant index_maps (fetched once); left at the
            # default buffering for portability.
            pl.BlockSpec((Cr, C), lambda n: (0, 0)),
            pl.BlockSpec((C, Cr), lambda n: (0, 0)),
            pl.BlockSpec((HW, HW), lambda n: (0, 0)),
            pl.BlockSpec((HW, HW), lambda n: (0, 0)),
        ],
        out_specs=pl.BlockSpec((nb, C, HW), lambda n: (n, 0, 0)),
        out_shape=jax.ShapeDtypeStruct((N, C, HW), jnp.float32),
        compiler_params=pltpu.CompilerParams(
            dimension_semantics=("parallel",),
            vmem_limit_bytes=32 * 1024 * 1024),
        cost_estimate=cost,
    )(x, ca_w1.astype(jnp.float32), ca_w2.astype(jnp.float32), wavg_t, wmax_t)

    return out.reshape(N, C, H, W)


# ---------------------------------------------------------------------------
# Pure-JAX reference (mirrors the PyTorch module) for the correctness check.
# ---------------------------------------------------------------------------
def cbam_reference(x_nchw, ca_w1, ca_w2, sa_w):
    avg = jnp.mean(x_nchw, axis=(2, 3))                # (N, C)
    mx = jnp.max(x_nchw, axis=(2, 3))                  # (N, C)

    def mlp(v):                                        # ca_w1: (Cr,C), ca_w2: (C,Cr)
        return jnp.maximum(v @ ca_w1.T, 0.0) @ ca_w2.T

    ca = jax.nn.sigmoid(mlp(avg) + mlp(mx))[:, :, None, None]
    y = x_nchw * ca
    m = jnp.concatenate([jnp.mean(y, axis=1, keepdims=True),
                         jnp.max(y, axis=1, keepdims=True)], axis=1)
    sa = lax.conv_general_dilated(
        m, sa_w[None].astype(jnp.float32), window_strides=(1, 1),
        padding=((3, 3), (3, 3)),
        dimension_numbers=('NCHW', 'OIHW', 'NCHW'))
    return y * jax.nn.sigmoid(sa)


if __name__ == "__main__":
    # Small shapes consistent with the module: ratio=16 => C must be >= 16.
    N, C, H, W = 2, 128, 16, 16
    ratio = 16
    Cr = C // ratio

    key = jax.random.PRNGKey(0)
    kx_, k1, k2, k3 = jax.random.split(key, 4)
    x = jax.random.normal(kx_, (N, C, H, W), jnp.float32)
    # PyTorch weight layouts: fc1 (Cr, C), fc2 (C, Cr), spatial conv (2, 7, 7).
    ca_w1 = jax.random.normal(k1, (Cr, C), jnp.float32) / jnp.sqrt(float(C))
    ca_w2 = jax.random.normal(k2, (C, Cr), jnp.float32) / jnp.sqrt(float(Cr))
    sa_w = jax.random.normal(k3, (2, 7, 7), jnp.float32) / jnp.sqrt(98.0)

    # Conv folding done once, outside the per-call jit path.
    wavg_t, wmax_t = jax.block_until_ready(fold_spatial_conv(sa_w, H, W, C))

    fwd = jax.jit(cbam_forward)
    out = jax.block_until_ready(fwd(x, ca_w1, ca_w2, wavg_t, wmax_t))

    ref = cbam_reference(x, ca_w1, ca_w2, sa_w)
    max_err = float(jnp.max(jnp.abs(out - ref)))
    mean_err = float(jnp.mean(jnp.abs(out - ref)))

    assert out.shape == (N, C, H, W)
    assert bool(jnp.all(jnp.isfinite(out)))
    # bf16 folded conv weights: worst-case a few 1e-3 vs. the f32 reference,
    # typical error stays ~1e-4.
    assert max_err < 2e-2, f"max abs err vs reference: {max_err}"
    assert mean_err < 1e-3, f"mean abs err vs reference: {mean_err}"
    print("KERNEL_OK")
</pallas_src>

<mosaic_0001>
module attributes {stable_mosaic.version = 11 : i64} {
  func.func @_cbam_kernel(%arg0: i32, %arg1: memref<2x128x256xf32, #tpu.memory_space<vmem>>, %arg2: memref<8x128xf32, #tpu.memory_space<vmem>>, %arg3: memref<128x8xf32, #tpu.memory_space<vmem>>, %arg4: memref<256x256xbf16, #tpu.memory_space<vmem>>, %arg5: memref<256x256xbf16, #tpu.memory_space<vmem>>, %arg6: memref<2x128x256xf32, #tpu.memory_space<vmem>>) attributes {dimension_semantics = [#tpu.dimension_semantics<parallel>], iteration_bounds = array<i64: 1>, scalar_prefetch = 0 : i64, scratch_operands = 0 : i64, tpu.core_type = #tpu.core_type<tc>, window_params = [{transform_indices = @transform_0, window_bounds = array<i64: 2, 128, 256>}, {pipeline_mode = #tpu.pipeline_mode<synchronous>, transform_indices = @transform_1, window_bounds = array<i64: 8, 128>}, {pipeline_mode = #tpu.pipeline_mode<synchronous>, transform_indices = @transform_2, window_bounds = array<i64: 128, 8>}, {pipeline_mode = #tpu.pipeline_mode<synchronous>, transform_indices = @transform_3, window_bounds = array<i64: 256, 256>}, {pipeline_mode = #tpu.pipeline_mode<synchronous>, transform_indices = @transform_4, window_bounds = array<i64: 256, 256>}, {transform_indices = @transform_5, window_bounds = array<i64: 2, 128, 256>}]} {
    %cst = arith.constant 1.000000e+00 : f32
    %0 = vector.broadcast %cst : f32 to vector<1x128xf32>
    %c0 = arith.constant 0 : index
    %c0_0 = arith.constant 0 : index
    %c0_1 = arith.constant 0 : index
    %1 = vector.load %arg1[%c0, %c0_0, %c0_1] : memref<2x128x256xf32, #tpu.memory_space<vmem>>, vector<1x128x256xf32>
    %2 = vector.shape_cast %1 : vector<1x128x256xf32> to vector<128x256xf32>
    %cst_2 = arith.constant dense<0.000000e+00> : vector<128xf32>
    %3 = vector.multi_reduction <add>, %2, %cst_2 [1] : vector<128x256xf32> to vector<128xf32>
    %4 = vector.shape_cast %3 : vector<128xf32> to vector<128x1xf32>
    %cst_3 = arith.constant 2.560000e+02 : f32
    %5 = vector.broadcast %cst_3 : f32 to vector<128x1xf32>
    %6 = arith.divf %4, %5 : vector<128x1xf32>
    %cst_4 = arith.constant dense<0xFF800000> : vector<128xf32>
    %7 = vector.multi_reduction <maximumf>, %2, %cst_4 [1] : vector<128x256xf32> to vector<128xf32>
    %8 = vector.shape_cast %7 : vector<128xf32> to vector<128x1xf32>
    %9 = tpu.iota {dimensions = array<i32: 1>} : vector<128x2xi32>
    %c0_i32 = arith.constant 0 : i32
    %10 = vector.broadcast %c0_i32 : i32 to vector<128x2xi32>
    %11 = arith.cmpi eq, %9, %10 : vector<128x2xi32>
    %12 = vector.shape_cast %6 : vector<128x1xf32> to vector<128x1xf32>
    %13 = vector.broadcast %12 : vector<128x1xf32> to vector<128x2xf32>
    %14 = vector.shape_cast %8 : vector<128x1xf32> to vector<128x1xf32>
    %15 = vector.broadcast %14 : vector<128x1xf32> to vector<128x2xf32>
    %16 = arith.select %11, %13, %15 : vector<128x2xi1>, vector<128x2xf32>
    %c0_5 = arith.constant 0 : index
    %c0_6 = arith.constant 0 : index
    %17 = vector.load %arg2[%c0_5, %c0_6] : memref<8x128xf32, #tpu.memory_space<vmem>>, vector<8x128xf32>
    %cst_7 = arith.constant dense<0.000000e+00> : vector<8x2xf32>
    %18 = tpu.matmul %17, %16, %cst_7 {dimension_numbers = #tpu.dot_dimension_numbers<[1], [0], [0], [1], [0, 0, 1, 1], [], []>} : vector<8x128xf32>, vector<128x2xf32>, vector<8x2xf32> -> vector<8x2xf32>
    %cst_8 = arith.constant 0.000000e+00 : f32
    %19 = vector.broadcast %cst_8 : f32 to vector<8x2xf32>
    %20 = arith.maximumf %18, %19 : vector<8x2xf32>
    %c0_9 = arith.constant 0 : index
    %c0_10 = arith.constant 0 : index
    %21 = vector.load %arg3[%c0_9, %c0_10] : memref<128x8xf32, #tpu.memory_space<vmem>>, vector<128x8xf32>
    %cst_11 = arith.constant dense<0.000000e+00> : vector<128x2xf32>
    %22 = tpu.matmul %21, %20, %cst_11 {dimension_numbers = #tpu.dot_dimension_numbers<[1], [0], [0], [1], [0, 0, 1, 1], [], []>} : vector<128x8xf32>, vector<8x2xf32>, vector<128x2xf32> -> vector<128x2xf32>
    %23 = vector.extract_strided_slice %22 {offsets = [0, 0], sizes = [128, 1], strides = [1, 1]} : vector<128x2xf32> to vector<128x1xf32>
    %24 = vector.extract_strided_slice %22 {offsets = [0, 1], sizes = [128, 1], strides = [1, 1]} : vector<128x2xf32> to vector<128x1xf32>
    %25 = arith.addf %23, %24 : vector<128x1xf32>
    %cst_12 = arith.constant 5.000000e-01 : f32
    %26 = vector.broadcast %cst_12 : f32 to vector<128x1xf32>
    %27 = arith.mulf %26, %25 : vector<128x1xf32>
    %28 = math.tanh %27 : vector<128x1xf32>
    %cst_13 = arith.constant 5.000000e-01 : f32
    %29 = vector.broadcast %cst_13 : f32 to vector<128x1xf32>
    %30 = arith.mulf %29, %28 : vector<128x1xf32>
    %cst_14 = arith.constant 5.000000e-01 : f32
    %31 = vector.broadcast %cst_14 : f32 to vector<128x1xf32>
    %32 = arith.addf %30, %31 : vector<128x1xf32>
    %33 = vector.broadcast %32 : vector<128x1xf32> to vector<128x256xf32>
    %34 = arith.mulf %2, %33 : vector<128x256xf32>
    %cst_15 = arith.constant dense<0.000000e+00> : vector<1x256xf32>
    %35 = tpu.matmul %0, %34, %cst_15 {dimension_numbers = #tpu.dot_dimension_numbers<[1], [0], [0], [1], [0, 0, 1, 1], [], []>} : vector<1x128xf32>, vector<128x256xf32>, vector<1x256xf32> -> vector<1x256xf32>
    %cst_16 = arith.constant dense<0xFF800000> : vector<256xf32>
    %36 = vector.multi_reduction <maximumf>, %34, %cst_16 [0] : vector<128x256xf32> to vector<256xf32>
    %37 = vector.shape_cast %36 : vector<256xf32> to vector<1x256xf32>
    %38 = arith.truncf %35 : vector<1x256xf32> to vector<1x256xbf16>
    %c0_17 = arith.constant 0 : index
    %c0_18 = arith.constant 0 : index
    %39 = vector.load %arg4[%c0_17, %c0_18] : memref<256x256xbf16, #tpu.memory_space<vmem>>, vector<256x256xbf16>
    %cst_19 = arith.constant dense<0.000000e+00> : vector<1x256xf32>
    %40 = tpu.matmul %38, %39, %cst_19 {dimension_numbers = #tpu.dot_dimension_numbers<[1], [0], [0], [1], [0, 0, 1, 1], [], []>} : vector<1x256xbf16>, vector<256x256xbf16>, vector<1x256xf32> -> vector<1x256xf32>
    %41 = arith.truncf %37 : vector<1x256xf32> to vector<1x256xbf16>
    %c0_20 = arith.constant 0 : index
    %c0_21 = arith.constant 0 : index
    %42 = vector.load %arg5[%c0_20, %c0_21] : memref<256x256xbf16, #tpu.memory_space<vmem>>, vector<256x256xbf16>
    %cst_22 = arith.constant dense<0.000000e+00> : vector<1x256xf32>
    %43 = tpu.matmul %41, %42, %cst_22 {dimension_numbers = #tpu.dot_dimension_numbers<[1], [0], [0], [1], [0, 0, 1, 1], [], []>} : vector<1x256xbf16>, vector<256x256xbf16>, vector<1x256xf32> -> vector<1x256xf32>
    %44 = arith.addf %40, %43 : vector<1x256xf32>
    %cst_23 = arith.constant 5.000000e-01 : f32
    %45 = vector.broadcast %cst_23 : f32 to vector<1x256xf32>
    %46 = arith.mulf %45, %44 : vector<1x256xf32>
    %47 = math.tanh %46 : vector<1x256xf32>
    %cst_24 = arith.constant 5.000000e-01 : f32
    %48 = vector.broadcast %cst_24 : f32 to vector<1x256xf32>
    %49 = arith.mulf %48, %47 : vector<1x256xf32>
    %cst_25 = arith.constant 5.000000e-01 : f32
    %50 = vector.broadcast %cst_25 : f32 to vector<1x256xf32>
    %51 = arith.addf %49, %50 : vector<1x256xf32>
    %52 = vector.broadcast %51 : vector<1x256xf32> to vector<128x256xf32>
    %53 = arith.mulf %34, %52 : vector<128x256xf32>
    %c0_26 = arith.constant 0 : index
    %c0_27 = arith.constant 0 : index
    %c0_28 = arith.constant 0 : index
    %54 = vector.load %arg6[%c0_26, %c0_27, %c0_28] : memref<2x128x256xf32, #tpu.memory_space<vmem>>, vector<1x128x256xf32>
    %55 = vector.shape_cast %54 : vector<1x128x256xf32> to vector<128x256xf32>
    %56 = vector.shape_cast %53 : vector<128x256xf32> to vector<1x128x256xf32>
    tpu.vector_store %arg6[%c0_26, %c0_27, %c0_28], %56 {strides = array<i32>} : memref<2x128x256xf32, #tpu.memory_space<vmem>>, vector<1x128x256xf32>,
    %c1 = arith.constant 1 : index
    %c0_29 = arith.constant 0 : index
    %c0_30 = arith.constant 0 : index
    %57 = vector.load %arg1[%c1, %c0_29, %c0_30] : memref<2x128x256xf32, #tpu.memory_space<vmem>>, vector<1x128x256xf32>
    %58 = vector.shape_cast %57 : vector<1x128x256xf32> to vector<128x256xf32>
    %cst_31 = arith.constant dense<0.000000e+00> : vector<128xf32>
    %59 = vector.multi_reduction <add>, %58, %cst_31 [1] : vector<128x256xf32> to vector<128xf32>
    %60 = vector.shape_cast %59 : vector<128xf32> to vector<128x1xf32>
    %cst_32 = arith.constant 2.560000e+02 : f32
    %61 = vector.broadcast %cst_32 : f32 to vector<128x1xf32>
    %62 = arith.divf %60, %61 : vector<128x1xf32>
    %cst_33 = arith.constant dense<0xFF800000> : vector<128xf32>
    %63 = vector.multi_reduction <maximumf>, %58, %cst_33 [1] : vector<128x256xf32> to vector<128xf32>
    %64 = vector.shape_cast %63 : vector<128xf32> to vector<128x1xf32>
    %65 = tpu.iota {dimensions = array<i32: 1>} : vector<128x2xi32>
    %c0_i32_34 = arith.constant 0 : i32
    %66 = vector.broadcast %c0_i32_34 : i32 to vector<128x2xi32>
    %67 = arith.cmpi eq, %65, %66 : vector<128x2xi32>
    %68 = vector.shape_cast %62 : vector<128x1xf32> to vector<128x1xf32>
    %69 = vector.broadcast %68 : vector<128x1xf32> to vector<128x2xf32>
    %70 = vector.shape_cast %64 : vector<128x1xf32> to vector<128x1xf32>
    %71 = vector.broadcast %70 : vector<128x1xf32> to vector<128x2xf32>
    %72 = arith.select %67, %69, %71 : vector<128x2xi1>, vector<128x2xf32>
    %c0_35 = arith.constant 0 : index
    %c0_36 = arith.constant 0 : index
    %73 = vector.load %arg2[%c0_35, %c0_36] : memref<8x128xf32, #tpu.memory_space<vmem>>, vector<8x128xf32>
    %cst_37 = arith.constant dense<0.000000e+00> : vector<8x2xf32>
    %74 = tpu.matmul %73, %72, %cst_37 {dimension_numbers = #tpu.dot_dimension_numbers<[1], [0], [0], [1], [0, 0, 1, 1], [], []>} : vector<8x128xf32>, vector<128x2xf32>, vector<8x2xf32> -> vector<8x2xf32>
    %cst_38 = arith.constant 0.000000e+00 : f32
    %75 = vector.broadcast %cst_38 : f32 to vector<8x2xf32>
    %76 = arith.maximumf %74, %75 : vector<8x2xf32>
    %c0_39 = arith.constant 0 : index
    %c0_40 = arith.constant 0 : index
    %77 = vector.load %arg3[%c0_39, %c0_40] : memref<128x8xf32, #tpu.memory_space<vmem>>, vector<128x8xf32>
    %cst_41 = arith.constant dense<0.000000e+00> : vector<128x2xf32>
    %78 = tpu.matmul %77, %76, %cst_41 {dimension_numbers = #tpu.dot_dimension_numbers<[1], [0], [0], [1], [0, 0, 1, 1], [], []>} : vector<128x8xf32>, vector<8x2xf32>, vector<128x2xf32> -> vector<128x2xf32>
    %79 = vector.extract_strided_slice %78 {offsets = [0, 0], sizes = [128, 1], strides = [1, 1]} : vector<128x2xf32> to vector<128x1xf32>
    %80 = vector.extract_strided_slice %78 {offsets = [0, 1], sizes = [128, 1], strides = [1, 1]} : vector<128x2xf32> to vector<128x1xf32>
    %81 = arith.addf %79, %80 : vector<128x1xf32>
    %cst_42 = arith.constant 5.000000e-01 : f32
    %82 = vector.broadcast %cst_42 : f32 to vector<128x1xf32>
    %83 = arith.mulf %82, %81 : vector<128x1xf32>
    %84 = math.tanh %83 : vector<128x1xf32>
    %cst_43 = arith.constant 5.000000e-01 : f32
    %85 = vector.broadcast %cst_43 : f32 to vector<128x1xf32>
    %86 = arith.mulf %85, %84 : vector<128x1xf32>
    %cst_44 = arith.constant 5.000000e-01 : f32
    %87 = vector.broadcast %cst_44 : f32 to vector<128x1xf32>
    %88 = arith.addf %86, %87 : vector<128x1xf32>
    %89 = vector.broadcast %88 : vector<128x1xf32> to vector<128x256xf32>
    %90 = arith.mulf %58, %89 : vector<128x256xf32>
    %cst_45 = arith.constant dense<0.000000e+00> : vector<1x256xf32>
    %91 = tpu.matmul %0, %90, %cst_45 {dimension_numbers = #tpu.dot_dimension_numbers<[1], [0], [0], [1], [0, 0, 1, 1], [], []>} : vector<1x128xf32>, vector<128x256xf32>, vector<1x256xf32> -> vector<1x256xf32>
    %cst_46 = arith.constant dense<0xFF800000> : vector<256xf32>
    %92 = vector.multi_reduction <maximumf>, %90, %cst_46 [0] : vector<128x256xf32> to vector<256xf32>
    %93 = vector.shape_cast %92 : vector<256xf32> to vector<1x256xf32>
    %94 = arith.truncf %91 : vector<1x256xf32> to vector<1x256xbf16>
    %c0_47 = arith.constant 0 : index
    %c0_48 = arith.constant 0 : index
    %95 = vector.load %arg4[%c0_47, %c0_48] : memref<256x256xbf16, #tpu.memory_space<vmem>>, vector<256x256xbf16>
    %cst_49 = arith.constant dense<0.000000e+00> : vector<1x256xf32>
    %96 = tpu.matmul %94, %95, %cst_49 {dimension_numbers = #tpu.dot_dimension_numbers<[1], [0], [0], [1], [0, 0, 1, 1], [], []>} : vector<1x256xbf16>, vector<256x256xbf16>, vector<1x256xf32> -> vector<1x256xf32>
    %97 = arith.truncf %93 : vector<1x256xf32> to vector<1x256xbf16>
    %c0_50 = arith.constant 0 : index
    %c0_51 = arith.constant 0 : index
    %98 = vector.load %arg5[%c0_50, %c0_51] : memref<256x256xbf16, #tpu.memory_space<vmem>>, vector<256x256xbf16>
    %cst_52 = arith.constant dense<0.000000e+00> : vector<1x256xf32>
    %99 = tpu.matmul %97, %98, %cst_52 {dimension_numbers = #tpu.dot_dimension_numbers<[1], [0], [0], [1], [0, 0, 1, 1], [], []>} : vector<1x256xbf16>, vector<256x256xbf16>, vector<1x256xf32> -> vector<1x256xf32>
    %100 = arith.addf %96, %99 : vector<1x256xf32>
    %cst_53 = arith.constant 5.000000e-01 : f32
    %101 = vector.broadcast %cst_53 : f32 to vector<1x256xf32>
    %102 = arith.mulf %101, %100 : vector<1x256xf32>
    %103 = math.tanh %102 : vector<1x256xf32>
    %cst_54 = arith.constant 5.000000e-01 : f32
    %104 = vector.broadcast %cst_54 : f32 to vector<1x256xf32>
    %105 = arith.mulf %104, %103 : vector<1x256xf32>
    %cst_55 = arith.constant 5.000000e-01 : f32
    %106 = vector.broadcast %cst_55 : f32 to vector<1x256xf32>
    %107 = arith.addf %105, %106 : vector<1x256xf32>
    %108 = vector.broadcast %107 : vector<1x256xf32> to vector<128x256xf32>
    %109 = arith.mulf %90, %108 : vector<128x256xf32>
    %c1_56 = arith.constant 1 : index
    %c0_57 = arith.constant 0 : index
    %c0_58 = arith.constant 0 : index
    %110 = vector.load %arg6[%c1_56, %c0_57, %c0_58] : memref<2x128x256xf32, #tpu.memory_space<vmem>>, vector<1x128x256xf32>
    %111 = vector.shape_cast %110 : vector<1x128x256xf32> to vector<128x256xf32>
    %112 = vector.shape_cast %109 : vector<128x256xf32> to vector<1x128x256xf32>
    tpu.vector_store %arg6[%c1_56, %c0_57, %c0_58], %112 {strides = array<i32>} : memref<2x128x256xf32, #tpu.memory_space<vmem>>, vector<1x128x256xf32>,
    return
  }
  func.func @transform_0(%arg0: i32) -> (i32, i32, i32) {
    %c0_i32 = arith.constant 0 : i32
    %c0_i32_0 = arith.constant 0 : i32
    %c0_i32_1 = arith.constant 0 : i32
    return %arg0, %c0_i32, %c0_i32_0 : i32, i32, i32
  }
  func.func @transform_1(%arg0: i32) -> (i32, i32) {
    %c0_i32 = arith.constant 0 : i32
    %c0_i32_0 = arith.constant 0 : i32
    %c0_i32_1 = arith.constant 0 : i32
    return %c0_i32, %c0_i32_0 : i32, i32
  }
  func.func @transform_2(%arg0: i32) -> (i32, i32) {
    %c0_i32 = arith.constant 0 : i32
    %c0_i32_0 = arith.constant 0 : i32
    %c0_i32_1 = arith.constant 0 : i32
    return %c0_i32, %c0_i32_0 : i32, i32
  }
  func.func @transform_3(%arg0: i32) -> (i32, i32) {
    %c0_i32 = arith.constant 0 : i32
    %c0_i32_0 = arith.constant 0 : i32
    %c0_i32_1 = arith.constant 0 : i32
    return %c0_i32, %c0_i32_0 : i32, i32
  }
  func.func @transform_4(%arg0: i32) -> (i32, i32) {
    %c0_i32 = arith.constant 0 : i32
    %c0_i32_0 = arith.constant 0 : i32
    %c0_i32_1 = arith.constant 0 : i32
    return %c0_i32, %c0_i32_0 : i32, i32
  }
  func.func @transform_5(%arg0: i32) -> (i32, i32, i32) {
    %c0_i32 = arith.constant 0 : i32
    %c0_i32_0 = arith.constant 0 : i32
    %c0_i32_1 = arith.constant 0 : i32
    return %arg0, %c0_i32, %c0_i32_0 : i32, i32, i32
  }
}

</mosaic_0001>

<bundles_post_ra>
// kernel: cbam_forward.1
= control target key start
LH: loop header
LB: loop body
LE: loop exit
PB: predicated region body
PF: predicated region fallthrough
CT: control target
= control target key end

     0   :  { %v3525_v31 = vmov 0.0|0.0   ;;  %vm3526_vm0 = vmmov 0   ;;  %vm272_vm2 = vcmask 64512   ;;  %s3528_s28 = smov 127   ;;  %s4987_s0 = inlined_call_operand.vmem [shape: f32[2,128,256], index: 0, kind: input, shape index: {}]   ;;  %s4988_s1 = inlined_call_operand.vmem [shape: f32[8,128], index: 1, kind: input, shape index: {}]   ;;  %s4989_s2 = inlined_call_operand.vmem [shape: f32[128,8], index: 2, kind: input, shape index: {}]   ;;  %s4990_s4 = inlined_call_operand.vmem [shape: bf16[256,256], index: 4, kind: input, shape index: {}]   ;;  %s4991_s3 = inlined_call_operand.vmem [shape: bf16[256,256], index: 3, kind: input, shape index: {}]   ;;  %s4992_s5 = inlined_call_operand.vmem [shape: f32[2,128,256], index: 5, kind: output, shape index: {}]  }
   0x1   :  { %v2831_v0 = vld [vmem:[%s4987_s0 + $0x100] sm:$0xff]  ;;  %v2832_v1 = vld [vmem:[%s4987_s0 + $0x108] sm:$0xff]  ;;  %v2833_v5 = vld [vmem:[%s4987_s0 + $0x110] sm:$0xff]  ;;  %3165 = vmatprep.subr.bf16.mxu0 %v3525_v31  ;;  %3221 = vmatprep.subr.bf16.mxu1 %v3525_v31 }
   0x2   :  { %v20_v2 = vld [vmem:[%s4987_s0] sm:$0xff]  ;;  %v1418_v3 = vadd.f32 %v2832_v1, %v2831_v0  ;;  %v21_v4 = vld [vmem:[%s4987_s0 + $0x8] sm:$0xff]  ;;  %v2834_v6 = vld [vmem:[%s4987_s0 + $0x118] sm:$0xff]  ;;  %v1482_v15 = vmax.f32 %v2831_v0, %v2832_v1 }
   0x3   :  { %v52_v7 = vadd.f32 %v21_v4, %v20_v2  ;;  %v22_v8 = vld [vmem:[%s4987_s0 + $0x10] sm:$0xff]  ;;  %v23_v9 = vld [vmem:[%s4987_s0 + $0x18] sm:$0xff]  ;;  %v1421_v10 = vadd.f32 %v2834_v6, %v2833_v5  ;;  %v117_v13 = vmax.f32 %v20_v2, %v21_v4  ;;  %v1485_v14 = vmax.f32 %v2833_v5, %v2834_v6  ;;  %v24_v18 = vld [vmem:[%s4987_s0 + $0x20] sm:$0xff] }
   0x4   :  { %1419 = vadd.xlane.f32.xlu1 %v1418_v3  ;;  %v55_v11 = vadd.f32 %v23_v9, %v22_v8  ;;  %v120_v12 = vmax.f32 %v22_v8, %v23_v9  ;;  %v26_v16 = vld [vmem:[%s4987_s0 + $0x30] sm:$0xff]  ;;  %v27_v17 = vld [vmem:[%s4987_s0 + $0x38] sm:$0xff]  ;;  %v25_v19 = vld [vmem:[%s4987_s0 + $0x28] sm:$0xff] }
   0x5   :  { %53 = vadd.xlane.f32.xlu0 %v52_v7  ;;  %v61_v20 = vadd.f32 %v27_v17, %v26_v16  ;;  %v58_v21 = vadd.f32 %v25_v19, %v24_v18  ;;  %v2837_v22 = vld [vmem:[%s4987_s0 + $0x130] sm:$0xff]  ;;  %v2838_v23 = vld [vmem:[%s4987_s0 + $0x138] sm:$0xff]  ;;  %v2835_v24 = vld [vmem:[%s4987_s0 + $0x120] sm:$0xff]  ;;  %v126_v28 = vmax.f32 %v26_v16, %v27_v17  ;;  %v123_v29 = vmax.f32 %v24_v18, %v25_v19 }
   0x6   :  { %v2836_v25 = vld [vmem:[%s4987_s0 + $0x128] sm:$0xff]  ;;  %v1427_v26 = vadd.f32 %v2838_v23, %v2837_v22  ;;  %v1491_v30 = vmax.f32 %v2837_v22, %v2838_v23  ;;  %v30_v33 = vld [vmem:[%s4987_s0 + $0x50] sm:$0xff]  ;;  %v31_v34 = vld [vmem:[%s4987_s0 + $0x58] sm:$0xff] }
   0x7   :  { %v1424_v27 = vadd.f32 %v2836_v25, %v2835_v24  ;;  %v1488_v32 = vmax.f32 %v2835_v24, %v2836_v25  ;;  %v28_v35 = vld [vmem:[%s4987_s0 + $0x40] sm:$0xff]  ;;  %v29_v36 = vld [vmem:[%s4987_s0 + $0x48] sm:$0xff]  ;;  %v67_v37 = vadd.f32 %v31_v34, %v30_v33  ;;  %v2841_v39 = vld [vmem:[%s4987_s0 + $0x150] sm:$0xff]  ;;  %v132_v45 = vmax.f32 %v30_v33, %v31_v34 }
   0x8   :  { %1422 = vadd.xlane.f32.xlu1 %v1421_v10  ;;  %v64_v38 = vadd.f32 %v29_v36, %v28_v35  ;;  %v2842_v40 = vld [vmem:[%s4987_s0 + $0x158] sm:$0xff]  ;;  %v2839_v41 = vld [vmem:[%s4987_s0 + $0x140] sm:$0xff]  ;;  %v2840_v42 = vld [vmem:[%s4987_s0 + $0x148] sm:$0xff]  ;;  %v129_v46 = vmax.f32 %v28_v35, %v29_v36 }
   0x9   :  { %56 = vadd.xlane.f32.xlu0 %v55_v11  ;;  %v1433_v43 = vadd.f32 %v2842_v40, %v2841_v39  ;;  %v1430_v44 = vadd.f32 %v2840_v42, %v2839_v41  ;;  %v1497_v47 = vmax.f32 %v2841_v39, %v2842_v40  ;;  %v1494_v48 = vmax.f32 %v2839_v41, %v2840_v42  ;;  %v34_v49 = vld [vmem:[%s4987_s0 + $0x70] sm:$0xff]  ;;  %v35_v50 = vld [vmem:[%s4987_s0 + $0x78] sm:$0xff]  ;;  %v32_v51 = vld [vmem:[%s4987_s0 + $0x60] sm:$0xff] }
   0xa   :  { %v33_v52 = vld [vmem:[%s4987_s0 + $0x68] sm:$0xff]  ;;  %v73_v53 = vadd.f32 %v35_v50, %v34_v49  ;;  %v2845_v55 = vld [vmem:[%s4987_s0 + $0x170] sm:$0xff]  ;;  %v2846_v56 = vld [vmem:[%s4987_s0 + $0x178] sm:$0xff]  ;;  %v138_v61 = vmax.f32 %v34_v49, %v35_v50 }
   0xb   :  { %v70_v54 = vadd.f32 %v33_v52, %v32_v51  ;;  %v2843_v57 = vld [vmem:[%s4987_s0 + $0x160] sm:$0xff]  ;;  %v2844_v58 = vld [vmem:[%s4987_s0 + $0x168] sm:$0xff]  ;;  %v1439_v59 = vadd.f32 %v2846_v56, %v2845_v55  ;;  %v135_v62 = vmax.f32 %v32_v51, %v33_v52  ;;  %v1503_v63 = vmax.f32 %v2845_v55, %v2846_v56  ;;  %v38_v1 = vld [vmem:[%s4987_s0 + $0x90] sm:$0xff] }
   0xc   :  { %121 = vmax.xlane.f32.xlu1 %v120_v12  ;;  %v1436_v60 = vadd.f32 %v2844_v58, %v2843_v57  ;;  %v1500_v0 = vmax.f32 %v2843_v57, %v2844_v58  ;;  %v39_v2 = vld [vmem:[%s4987_s0 + $0x98] sm:$0xff]  ;;  %v36_v3 = vld [vmem:[%s4987_s0 + $0x80] sm:$0xff]  ;;  %v37_v4 = vld [vmem:[%s4987_s0 + $0x88] sm:$0xff] }
   0xd   :  { %118 = vmax.xlane.f32.xlu0 %v117_v13  ;;  %v79_v5 = vadd.f32 %v39_v2, %v38_v1  ;;  %v76_v6 = vadd.f32 %v37_v4, %v36_v3  ;;  %v2849_v7 = vld [vmem:[%s4987_s0 + $0x190] sm:$0xff]  ;;  %v2850_v8 = vld [vmem:[%s4987_s0 + $0x198] sm:$0xff]  ;;  %v2847_v9 = vld [vmem:[%s4987_s0 + $0x180] sm:$0xff]  ;;  %v144_v13 = vmax.f32 %v38_v1, %v39_v2  ;;  %v4993_v2 = vlaneseq }
   0xe   :  { %v2848_v10 = vld [vmem:[%s4987_s0 + $0x188] sm:$0xff]  ;;  %v1445_v11 = vadd.f32 %v2850_v8, %v2849_v7  ;;  %v42_v17 = vld [vmem:[%s4987_s0 + $0xb0] sm:$0xff]  ;;  %v43_v18 = vld [vmem:[%s4987_s0 + $0xb8] sm:$0xff] }
   0xf   :  { %v1442_v12 = vadd.f32 %v2848_v10, %v2847_v9  ;;  %v1506_v16 = vmax.f32 %v2847_v9, %v2848_v10  ;;  %v40_v19 = vld [vmem:[%s4987_s0 + $0xa0] sm:$0xff]  ;;  %v2853_v23 = vld [vmem:[%s4987_s0 + $0x1b0] sm:$0xff]  ;;  %v2854_v24 = vld [vmem:[%s4987_s0 + $0x1b8] sm:$0xff] }
  0x10   :  { %1486 = vmax.xlane.f32.xlu1 %v1485_v14  ;;  %v141_v14 = vmax.f32 %v36_v3, %v37_v4  ;;  %v2851_v25 = vld [vmem:[%s4987_s0 + $0x1a0] sm:$0xff]  ;;  %v46_v34 = vld [vmem:[%s4987_s0 + $0xd0] sm:$0xff]  ;;  %v47_v35 = vld [vmem:[%s4987_s0 + $0xd8] sm:$0xff]  ;;  %v3527_v3 = vmov 0.0  }
  0x11   :  { %1483 = vmax.xlane.f32.xlu0 %v1482_v15  ;;  %v1509_v15 = vmax.f32 %v2849_v7, %v2850_v8  ;;  %v44_v36 = vld [vmem:[%s4987_s0 + $0xc0] sm:$0xff]  ;;  %v2857_v40 = vld [vmem:[%s4987_s0 + $0x1d0] sm:$0xff]  ;;  %v2858_v41 = vld [vmem:[%s4987_s0 + $0x1d8] sm:$0xff]  ;;  %3075 = vmatprep.mubr.msk.f32.mxu0 %vm3526_vm0, %v3527_v3 }
  0x12   :  { %v2855_v42 = vld [vmem:[%s4987_s0 + $0x1c0] sm:$0xff]  ;;  %v50_v50 = vld [vmem:[%s4987_s0 + $0xf0] sm:$0xff]  ;;  %v51_v51 = vld [vmem:[%s4987_s0 + $0xf8] sm:$0xff]  ;;  %3136 = vmatprep.mubr.msk.f32.mxu1 %vm3526_vm0, %v3527_v3 }
  0x13   :  { %v48_v52 = vld [vmem:[%s4987_s0 + $0xe0] sm:$0xff]  ;;  %v2861_v56 = vld [vmem:[%s4987_s0 + $0x1f0] sm:$0xff]  ;;  %v2862_v57 = vld [vmem:[%s4987_s0 + $0x1f8] sm:$0xff] }
  0x14   :  { %62 = vadd.xlane.f32.xlu1 %v61_v20  ;;  %v41_v20 = vld [vmem:[%s4987_s0 + $0xa8] sm:$0xff]  ;;  %v2859_v58 = vld [vmem:[%s4987_s0 + $0x1e0] sm:$0xff] }
  0x15   :  { %59 = vadd.xlane.f32.xlu0 %v58_v21  ;;  %v85_v21 = vadd.f32 %v43_v18, %v42_v17  ;;  %v82_v22 = vadd.f32 %v41_v20, %v40_v19 }
  0x18   :  { %1428 = vadd.xlane.f32.xlu1 %v1427_v26  ;;  %v2852_v26 = vld [vmem:[%s4987_s0 + $0x1a8] sm:$0xff] }
  0x19   :  { %1425 = vadd.xlane.f32.xlu0 %v1424_v27  ;;  %v1451_v27 = vadd.f32 %v2854_v24, %v2853_v23  ;;  %v1512_v33 = vmax.f32 %v2851_v25, %v2852_v26 }
  0x1c   :  { %127 = vmax.xlane.f32.xlu1 %v126_v28  ;;  %v1448_v28 = vadd.f32 %v2852_v26, %v2851_v25 }
  0x1d   :  { %124 = vmax.xlane.f32.xlu0 %v123_v29  ;;  %v150_v29 = vmax.f32 %v42_v17, %v43_v18 }
  0x20   :  { %1492 = vmax.xlane.f32.xlu1 %v1491_v30  ;;  %v147_v30 = vmax.f32 %v40_v19, %v41_v20 }
  0x21   :  { %1489 = vmax.xlane.f32.xlu0 %v1488_v32  ;;  %v1515_v32 = vmax.f32 %v2853_v23, %v2854_v24 }
  0x24   :  { %68 = vadd.xlane.f32.xlu1 %v67_v37  ;;  %v45_v37 = vld [vmem:[%s4987_s0 + $0xc8] sm:$0xff] }
  0x25   :  { %65 = vadd.xlane.f32.xlu0 %v64_v38  ;;  %v91_v38 = vadd.f32 %v47_v35, %v46_v34  ;;  %v88_v39 = vadd.f32 %v45_v37, %v44_v36 }
  0x28   :  { %1434 = vadd.xlane.f32.xlu1 %v1433_v43  ;;  %v2856_v43 = vld [vmem:[%s4987_s0 + $0x1c8] sm:$0xff] }
  0x29   :  { %1431 = vadd.xlane.f32.xlu0 %v1430_v44  ;;  %v1457_v44 = vadd.f32 %v2858_v41, %v2857_v40  ;;  %v1518_v49 = vmax.f32 %v2855_v42, %v2856_v43 }
  0x2c   :  { %133 = vmax.xlane.f32.xlu1 %v132_v45  ;;  %v1454_v45 = vadd.f32 %v2856_v43, %v2855_v42 }
  0x2d   :  { %130 = vmax.xlane.f32.xlu0 %v129_v46  ;;  %v156_v46 = vmax.f32 %v46_v34, %v47_v35 }
  0x30   :  { %1498 = vmax.xlane.f32.xlu1 %v1497_v47  ;;  %v153_v47 = vmax.f32 %v44_v36, %v45_v37 }
  0x31   :  { %1495 = vmax.xlane.f32.xlu0 %v1494_v48  ;;  %v1521_v48 = vmax.f32 %v2857_v40, %v2858_v41 }
  0x34   :  { %74 = vadd.xlane.f32.xlu1 %v73_v53  ;;  %v49_v53 = vld [vmem:[%s4987_s0 + $0xe8] sm:$0xff] }
  0x35   :  { %71 = vadd.xlane.f32.xlu0 %v70_v54  ;;  %v97_v54 = vadd.f32 %v51_v51, %v50_v50  ;;  %v94_v55 = vadd.f32 %v49_v53, %v48_v52 }
  0x38   :  { %1440 = vadd.xlane.f32.xlu1 %v1439_v59  ;;  %v2860_v59 = vld [vmem:[%s4987_s0 + $0x1e8] sm:$0xff] }
  0x39   :  { %1437 = vadd.xlane.f32.xlu0 %v1436_v60  ;;  %v1463_v60 = vadd.f32 %v2862_v57, %v2861_v56  ;;  %v1524_v1 = vmax.f32 %v2859_v58, %v2860_v59 }
  0x3c   :  { %139 = vmax.xlane.f32.xlu1 %v138_v61  ;;  %v1460_v61 = vadd.f32 %v2860_v59, %v2859_v58 }
  0x3d   :  { %136 = vmax.xlane.f32.xlu0 %v135_v62  ;;  %v162_v62 = vmax.f32 %v50_v50, %v51_v51 }
  0x40   :  { %1504 = vmax.xlane.f32.xlu1 %v1503_v63  ;;  %v159_v63 = vmax.f32 %v48_v52, %v49_v53 }
  0x41   :  { %1501 = vmax.xlane.f32.xlu0 %v1500_v0  ;;  %v1527_v0 = vmax.f32 %v2861_v56, %v2862_v57 }
  0x44   :  { %80 = vadd.xlane.f32.xlu1 %v79_v5 }
  0x45   :  { %77 = vadd.xlane.f32.xlu0 %v76_v6  ;;  %v3758_v6 = vand.u32 127, %v4993_v2 }
  0x47   :  { %vm167_vm1 = vcmp.eq.s32.totalorder %v3758_v6, 0  ;;  %v257_v6 = vld [vmem:[%s4989_s2 + $0x8] sm:$0xff] }
  0x48   :  { %1446 = vadd.xlane.f32.xlu1 %v1445_v11 }
  0x49   :  { %1443 = vadd.xlane.f32.xlu0 %v1442_v12 }
  0x4c   :  { %145 = vmax.xlane.f32.xlu1 %v144_v13 }
  0x4d   :  { %142 = vmax.xlane.f32.xlu0 %v141_v14 }
  0x50   :  { %1510 = vmax.xlane.f32.xlu1 %v1509_v15 }
  0x51   :  { %1507 = vmax.xlane.f32.xlu0 %v1506_v16 }
  0x54   :  { %86 = vadd.xlane.f32.xlu1 %v85_v21 }
  0x55   :  { %83 = vadd.xlane.f32.xlu0 %v82_v22 }
  0x58   :  { %1452 = vadd.xlane.f32.xlu1 %v1451_v27 }
  0x59   :  { %1449 = vadd.xlane.f32.xlu0 %v1448_v28 }
  0x5c   :  { %151 = vmax.xlane.f32.xlu1 %v150_v29 }
  0x5d   :  { %148 = vmax.xlane.f32.xlu0 %v147_v30 }
  0x60   :  { %1516 = vmax.xlane.f32.xlu1 %v1515_v32 }
  0x61   :  { %1513 = vmax.xlane.f32.xlu0 %v1512_v33 }
  0x64   :  { %92 = vadd.xlane.f32.xlu1 %v91_v38 }
  0x65   :  { %89 = vadd.xlane.f32.xlu0 %v88_v39 }
  0x68   :  { %1458 = vadd.xlane.f32.xlu1 %v1457_v44 }
  0x69   :  { %1455 = vadd.xlane.f32.xlu0 %v1454_v45 }
  0x6c   :  { %157 = vmax.xlane.f32.xlu1 %v156_v46 }
  0x6d   :  { %154 = vmax.xlane.f32.xlu0 %v153_v47 }
  0x70   :  { %1522 = vmax.xlane.f32.xlu1 %v1521_v48 }
  0x71   :  { %1519 = vmax.xlane.f32.xlu0 %v1518_v49 }
  0x74   :  { %98 = vadd.xlane.f32.xlu1 %v97_v54 }
  0x75   :  { %95 = vadd.xlane.f32.xlu0 %v94_v55 }
  0x78   :  { %1464 = vadd.xlane.f32.xlu1 %v1463_v60 }
  0x79   :  { %1461 = vadd.xlane.f32.xlu0 %v1460_v61 }
  0x7c   :  { %163 = vmax.xlane.f32.xlu1 %v162_v62 }
  0x7d   :  { %160 = vmax.xlane.f32.xlu0 %v159_v63 }
  0x80   :  { %1528 = vmax.xlane.f32.xlu1 %v1527_v0 }
  0x81   :  { %1525 = vmax.xlane.f32.xlu0 %v1524_v1 }
  0x91   :  { %v1420_v4 = vpop.xlane.xlu1 %1419 }
  0x92   :  { %v54_v5 = vpop.xlane.xlu0 %53  ;;  %v1466_v17 = vmul.f32 0.00390625, %v1420_v4 }
  0x93   :  { %v101_v10 = vmul.f32 0.00390625, %v54_v5 }
  0x95   :  { %v1423_v7 = vpop.xlane.xlu1 %1422 }
  0x96   :  { %v57_v8 = vpop.xlane.xlu0 %56  ;;  %v1467_v15 = vmul.f32 0.00390625, %v1423_v7 }
  0x97   :  { %v102_v9 = vmul.f32 0.00390625, %v57_v8 }
  0x99   :  { %v122_v11 = vpop.xlane.xlu1 %121 }
  0x9a   :  { %v169_v12 = vsel %vm167_vm1, %v102_v9, %v122_v11  ;;  %v119_v13 = vpop.xlane.xlu0 %118 }
  0x9b   :  { %v168_v14 = vsel %vm167_vm1, %v101_v10, %v119_v13 }
  0x9c   :  { %v3166_v16 = vpack.c.bf16 %v169_v12, %v168_v14 }
  0x9d   :  { %v1487_v18 = vpop.xlane.xlu1 %1486 }
  0x9e   :  { %v1531_v19 = vsel %vm167_vm1, %v1467_v15, %v1487_v18  ;;  %3167 = vmatpush3.bf16.msra.mxu0 %v3166_v16  ;;  %v1484_v20 = vpop.xlane.xlu0 %1483 }
  0x9f   :  { %v1530_v21 = vsel %vm167_vm1, %v1466_v17, %v1484_v20  ;;  %3168 = vmatprep.subr.bf16.mxu0 %v3525_v31 }
  0xa0   :  { %v3222_v22 = vpack.c.bf16 %v1531_v19, %v1530_v21 }
  0xa1   :  { %v63_v23 = vpop.xlane.xlu1 %62 }
  0xa2   :  { %3223 = vmatpush3.bf16.msra.mxu1 %v3222_v22  ;;  %v60_v24 = vpop.xlane.xlu0 %59  ;;  %v104_v27 = vmul.f32 0.00390625, %v63_v23 }
  0xa3   :  { %3224 = vmatprep.subr.bf16.mxu1 %v3525_v31  ;;  %v103_v28 = vmul.f32 0.00390625, %v60_v24 }
  0xa5   :  { %v1429_v25 = vpop.xlane.xlu1 %1428 }
  0xa6   :  { %v1426_v26 = vpop.xlane.xlu0 %1425  ;;  %v1469_v34 = vmul.f32 0.00390625, %v1429_v25 }
  0xa7   :  { %v1468_v36 = vmul.f32 0.00390625, %v1426_v26 }
  0xa9   :  { %v128_v29 = vpop.xlane.xlu1 %127 }
  0xaa   :  { %v171_v30 = vsel %vm167_vm1, %v104_v27, %v128_v29  ;;  %v125_v32 = vpop.xlane.xlu0 %124 }
  0xab   :  { %v170_v33 = vsel %vm167_vm1, %v103_v28, %v125_v32 }
  0xac   :  { %v3169_v35 = vpack.c.bf16 %v171_v30, %v170_v33 }
  0xad   :  { %v1493_v37 = vpop.xlane.xlu1 %1492 }
  0xae   :  { %v1533_v38 = vsel %vm167_vm1, %v1469_v34, %v1493_v37  ;;  %3170 = vmatpush3.bf16.msra.mxu0 %v3169_v35  ;;  %v1490_v39 = vpop.xlane.xlu0 %1489 }
  0xaf   :  { %v1532_v40 = vsel %vm167_vm1, %v1468_v36, %v1490_v39  ;;  %3171 = vmatprep.subr.bf16.mxu0 %v3525_v31 }
  0xb0   :  { %v3225_v41 = vpack.c.bf16 %v1533_v38, %v1532_v40 }
  0xb1   :  { %v69_v42 = vpop.xlane.xlu1 %68 }
  0xb2   :  { %3226 = vmatpush3.bf16.msra.mxu1 %v3225_v41  ;;  %v66_v43 = vpop.xlane.xlu0 %65  ;;  %v106_v46 = vmul.f32 0.00390625, %v69_v42 }
  0xb3   :  { %3227 = vmatprep.subr.bf16.mxu1 %v3525_v31  ;;  %v105_v47 = vmul.f32 0.00390625, %v66_v43 }
  0xb5   :  { %v1435_v44 = vpop.xlane.xlu1 %1434 }
  0xb6   :  { %v1432_v45 = vpop.xlane.xlu0 %1431  ;;  %v1471_v52 = vmul.f32 0.00390625, %v1435_v44 }
  0xb7   :  { %v1470_v54 = vmul.f32 0.00390625, %v1432_v45 }
  0xb9   :  { %v134_v48 = vpop.xlane.xlu1 %133 }
  0xba   :  { %v173_v49 = vsel %vm167_vm1, %v106_v46, %v134_v48  ;;  %v131_v50 = vpop.xlane.xlu0 %130 }
  0xbb   :  { %v172_v51 = vsel %vm167_vm1, %v105_v47, %v131_v50 }
  0xbc   :  { %v3172_v53 = vpack.c.bf16 %v173_v49, %v172_v51 }
  0xbd   :  { %v1499_v55 = vpop.xlane.xlu1 %1498 }
  0xbe   :  { %v1535_v56 = vsel %vm167_vm1, %v1471_v52, %v1499_v55  ;;  %3173 = vmatpush3.bf16.msra.mxu0 %v3172_v53  ;;  %v1496_v57 = vpop.xlane.xlu0 %1495 }
  0xbf   :  { %v1534_v58 = vsel %vm167_vm1, %v1470_v54, %v1496_v57  ;;  %3174 = vmatprep.subr.bf16.mxu0 %v3525_v31 }
  0xc0   :  { %v3228_v59 = vpack.c.bf16 %v1535_v56, %v1534_v58 }
  0xc1   :  { %v75_v60 = vpop.xlane.xlu1 %74 }
  0xc2   :  { %3229 = vmatpush3.bf16.msra.mxu1 %v3228_v59  ;;  %v72_v61 = vpop.xlane.xlu0 %71  ;;  %v108_v0 = vmul.f32 0.00390625, %v75_v60 }
  0xc3   :  { %3230 = vmatprep.subr.bf16.mxu1 %v3525_v31  ;;  %v107_v1 = vmul.f32 0.00390625, %v72_v61 }
  0xc5   :  { %v1441_v62 = vpop.xlane.xlu1 %1440 }
  0xc6   :  { %v1438_v63 = vpop.xlane.xlu0 %1437  ;;  %v1473_v9 = vmul.f32 0.00390625, %v1441_v62 }
  0xc7   :  { %v1472_v11 = vmul.f32 0.00390625, %v1438_v63 }
  0xc9   :  { %v140_v4 = vpop.xlane.xlu1 %139 }
  0xca   :  { %v175_v5 = vsel %vm167_vm1, %v108_v0, %v140_v4  ;;  %v137_v7 = vpop.xlane.xlu0 %136 }
  0xcb   :  { %v174_v8 = vsel %vm167_vm1, %v107_v1, %v137_v7 }
  0xcc   :  { %v3175_v10 = vpack.c.bf16 %v175_v5, %v174_v8 }
  0xcd   :  { %v1505_v12 = vpop.xlane.xlu1 %1504 }
  0xce   :  { %v1537_v13 = vsel %vm167_vm1, %v1473_v9, %v1505_v12  ;;  %3176 = vmatpush3.bf16.msra.mxu0 %v3175_v10  ;;  %v1502_v14 = vpop.xlane.xlu0 %1501 }
  0xcf   :  { %v1536_v15 = vsel %vm167_vm1, %v1472_v11, %v1502_v14  ;;  %3177 = vmatprep.subr.bf16.mxu0 %v3525_v31 }
  0xd0   :  { %v3231_v16 = vpack.c.bf16 %v1537_v13, %v1536_v15 }
  0xd1   :  { %v81_v17 = vpop.xlane.xlu1 %80 }
  0xd2   :  { %3232 = vmatpush3.bf16.msra.mxu1 %v3231_v16  ;;  %v78_v18 = vpop.xlane.xlu0 %77  ;;  %v110_v21 = vmul.f32 0.00390625, %v81_v17 }
  0xd3   :  { %3233 = vmatprep.subr.bf16.mxu1 %v3525_v31  ;;  %v109_v22 = vmul.f32 0.00390625, %v78_v18 }
  0xd5   :  { %v1447_v19 = vpop.xlane.xlu1 %1446 }
  0xd6   :  { %v1444_v20 = vpop.xlane.xlu0 %1443  ;;  %v1475_v27 = vmul.f32 0.00390625, %v1447_v19 }
  0xd7   :  { %v1474_v29 = vmul.f32 0.00390625, %v1444_v20 }
  0xd9   :  { %v146_v23 = vpop.xlane.xlu1 %145 }
  0xda   :  { %v177_v24 = vsel %vm167_vm1, %v110_v21, %v146_v23  ;;  %v143_v25 = vpop.xlane.xlu0 %142 }
  0xdb   :  { %v176_v26 = vsel %vm167_vm1, %v109_v22, %v143_v25 }
  0xdc   :  { %v3178_v28 = vpack.c.bf16 %v177_v24, %v176_v26  ;;  %v184_v26 = vld [vmem:[%s4988_s1] sm:$0xff] }
  0xdd   :  { %v1511_v30 = vpop.xlane.xlu1 %1510 }
  0xde   :  { %v1539_v32 = vsel %vm167_vm1, %v1475_v27, %v1511_v30  ;;  %3179 = vmatpush3.bf16.msra.mxu0 %v3178_v28  ;;  %v1508_v33 = vpop.xlane.xlu0 %1507 }
  0xdf   :  { %v1538_v34 = vsel %vm167_vm1, %v1474_v29, %v1508_v33  ;;  %3180 = vmatprep.subr.bf16.mxu0 %v3525_v31  ;;  %v256_v29 = vld [vmem:[%s4989_s2] sm:$0xff] }
  0xe0   :  { %v3234_v35 = vpack.c.bf16 %v1539_v32, %v1538_v34  ;;  %v258_v34 = vld [vmem:[%s4989_s2 + $0x10] sm:$0xff] }
  0xe1   :  { %v87_v36 = vpop.xlane.xlu1 %86 }
  0xe2   :  { %3235 = vmatpush3.bf16.msra.mxu1 %v3234_v35  ;;  %v84_v37 = vpop.xlane.xlu0 %83  ;;  %v112_v40 = vmul.f32 0.00390625, %v87_v36 }
  0xe3   :  { %3236 = vmatprep.subr.bf16.mxu1 %v3525_v31  ;;  %v111_v41 = vmul.f32 0.00390625, %v84_v37 }
  0xe5   :  { %v1453_v38 = vpop.xlane.xlu1 %1452 }
  0xe6   :  { %v1450_v39 = vpop.xlane.xlu0 %1449  ;;  %v1477_v46 = vmul.f32 0.00390625, %v1453_v38  ;;  %v259_v38 = vld [vmem:[%s4989_s2 + $0x18] sm:$0xff] }
  0xe7   :  { %v1476_v48 = vmul.f32 0.00390625, %v1450_v39  ;;  %v260_v39 = vld [vmem:[%s4989_s2 + $0x20] sm:$0xff] }
  0xe9   :  { %v152_v42 = vpop.xlane.xlu1 %151 }
  0xea   :  { %v179_v43 = vsel %vm167_vm1, %v112_v40, %v152_v42  ;;  %v149_v44 = vpop.xlane.xlu0 %148  ;;  %v261_v40 = vld [vmem:[%s4989_s2 + $0x28] sm:$0xff]  ;;  %v263_v42 = vld [vmem:[%s4989_s2 + $0x38] sm:$0xff] }
  0xeb   :  { %v178_v45 = vsel %vm167_vm1, %v111_v41, %v149_v44  ;;  %v262_v41 = vld [vmem:[%s4989_s2 + $0x30] sm:$0xff]  ;;  %v265_v44 = vld [vmem:[%s4989_s2 + $0x48] sm:$0xff] }
  0xec   :  { %v3181_v47 = vpack.c.bf16 %v179_v43, %v178_v45  ;;  %v264_v43 = vld [vmem:[%s4989_s2 + $0x40] sm:$0xff]  ;;  %v266_v45 = vld [vmem:[%s4989_s2 + $0x50] sm:$0xff] }
  0xed   :  { %v1517_v49 = vpop.xlane.xlu1 %1516 }
  0xee   :  { %v1541_v50 = vsel %vm167_vm1, %v1477_v46, %v1517_v49  ;;  %3182 = vmatpush3.bf16.msra.mxu0 %v3181_v47  ;;  %v1514_v51 = vpop.xlane.xlu0 %1513  ;;  %v267_v46 = vld [vmem:[%s4989_s2 + $0x58] sm:$0xff]  ;;  %v268_v47 = vld [vmem:[%s4989_s2 + $0x60] sm:$0xff]  ;;  %v270_v49 = vld [vmem:[%s4989_s2 + $0x70] sm:$0xff] }
  0xef   :  { %v1540_v52 = vsel %vm167_vm1, %v1476_v48, %v1514_v51  ;;  %3183 = vmatprep.subr.bf16.mxu0 %v3525_v31  ;;  %v269_v48 = vld [vmem:[%s4989_s2 + $0x68] sm:$0xff] }
  0xf0   :  { %v3237_v53 = vpack.c.bf16 %v1541_v50, %v1540_v52  ;;  %v271_v50 = vld [vmem:[%s4989_s2 + $0x78] sm:$0xff] }
  0xf1   :  { %v93_v54 = vpop.xlane.xlu1 %92 }
  0xf2   :  { %3238 = vmatpush3.bf16.msra.mxu1 %v3237_v53  ;;  %v90_v55 = vpop.xlane.xlu0 %89  ;;  %v114_v58 = vmul.f32 0.00390625, %v93_v54 }
  0xf3   :  { %3239 = vmatprep.subr.bf16.mxu1 %v3525_v31  ;;  %v113_v59 = vmul.f32 0.00390625, %v90_v55 }
  0xf5   :  { %v1459_v56 = vpop.xlane.xlu1 %1458 }
  0xf6   :  { %v1456_v57 = vpop.xlane.xlu0 %1455  ;;  %v1479_v0 = vmul.f32 0.00390625, %v1459_v56  ;;  %v3529_v56 = vmov 0  }
  0xf7   :  { %v1478_v4 = vmul.f32 0.00390625, %v1456_v57  ;;  %3291 = vset.pattern.permute.xlu1 %v3529_v56  ;;  %3292 = vset.pattern.permute.xlu0 %v3529_v56 }
  0xf9   :  { %v158_v60 = vpop.xlane.xlu1 %157 }
  0xfa   :  { %v181_v61 = vsel %vm167_vm1, %v114_v58, %v158_v60  ;;  %v155_v62 = vpop.xlane.xlu0 %154 }
  0xfb   :  { %v180_v63 = vsel %vm167_vm1, %v113_v59, %v155_v62 }
  0xfc   :  { %v3184_v1 = vpack.c.bf16 %v181_v61, %v180_v63 }
  0xfd   :  { %v1523_v5 = vpop.xlane.xlu1 %1522 }
  0xfe   :  { %v1543_v7 = vsel %vm167_vm1, %v1479_v0, %v1523_v5  ;;  %3185 = vmatpush3.bf16.msra.mxu0 %v3184_v1  ;;  %v1520_v8 = vpop.xlane.xlu0 %1519 }
  0xff   :  { %v1542_v9 = vsel %vm167_vm1, %v1478_v4, %v1520_v8  ;;  %3186 = vmatprep.subr.bf16.mxu0 %v3525_v31 }
 0x100   :  { %v3240_v10 = vpack.c.bf16 %v1543_v7, %v1542_v9 }
 0x101   :  { %v99_v11 = vpop.xlane.xlu1 %98 }
 0x102   :  { %3241 = vmatpush3.bf16.msra.mxu1 %v3240_v10  ;;  %v96_v12 = vpop.xlane.xlu0 %95  ;;  %v116_v15 = vmul.f32 0.00390625, %v99_v11 }
 0x103   :  { %3242 = vmatprep.subr.bf16.mxu1 %v3525_v31  ;;  %v115_v16 = vmul.f32 0.00390625, %v96_v12 }
 0x105   :  { %v1465_v13 = vpop.xlane.xlu1 %1464 }
 0x106   :  { %v1462_v14 = vpop.xlane.xlu0 %1461  ;;  %v1481_v21 = vmul.f32 0.00390625, %v1465_v13 }
 0x107   :  { %v1480_v23 = vmul.f32 0.00390625, %v1462_v14 }
 0x109   :  { %v164_v17 = vpop.xlane.xlu1 %163 }
 0x10a   :  { %v183_v18 = vsel %vm167_vm1, %v116_v15, %v164_v17  ;;  %v161_v19 = vpop.xlane.xlu0 %160 }
 0x10b   :  { %v182_v20 = vsel %vm167_vm1, %v115_v16, %v161_v19 }
 0x10c   :  { %v3187_v22 = vpack.c.bf16 %v183_v18, %v182_v20 }
 0x10d   :  { %v1529_v24 = vpop.xlane.xlu1 %1528 }
 0x10e   :  { %v1545_v25 = vsel %vm167_vm1, %v1481_v21, %v1529_v24  ;;  %3188 = vmatpush3.bf16.msra.mxu0 %v3187_v22  ;;  %v1526_v31 = vpop.xlane.xlu0 %1525 }
 0x10f   :  { %v1544_v27 = vsel %vm167_vm1, %v1480_v23, %v1526_v31 }
 0x110   :  { %v3243_v28 = vpack.c.bf16 %v1545_v25, %v1544_v27 }
 0x111   :  { %3076 = vmatmul.mubr.f32.vlgmr.msra.gmra.mrb[0].mxu0 %v184_v26 }
 0x112   :  { %3244 = vmatpush3.bf16.msra.mxu1 %v3243_v28  ;;  %3080 = vmatprep.mubr.msk.f32.mxu0 %vm272_vm2, %v256_v29 }
 0x115   :  { %3137 = vmatmul.mubr.f32.vlgmr.msra.gmra.mrb[0].mxu1 %v184_v26 }
 0x116   :  { %3141 = vmatprep.mubr.msk.f32.mxu1 %vm272_vm2, %v256_v29 }
 0x1e4   :  { %v251_v30 = vpop.f32.mrb[0].mxu0 }
 0x1e5   :  { %v255_v32 = vmax.f32 %v251_v30, 0.0  ;;  %v3077_v33 = vpop.f32.mrb[1].mxu0 }
 0x1e7   :  { %3078 = vmatprep.subr.mxu0 %v255_v32 }
 0x1e8   :  { %3079 = vmatpush3.msra.mxu0 %v255_v32  ;;  %v1613_v35 = vpop.f32.mrb[0].mxu1 }
 0x1e9   :  { %v1617_v36 = vmax.f32 %v1613_v35, 0.0  ;;  %3081 = vmatmul.mubr.msk.f32.vlgmr.msra.gmra.mrb[2].mxu0 %vm272_vm2, %v257_v6  ;;  %v3138_v37 = vpop.f32.mrb[1].mxu1 }
 0x1ea   :  { %3083 = vmatprep.mubr.msk.f32.mxu0 %vm272_vm2, %v258_v34 }
 0x1eb   :  { %3139 = vmatprep.subr.mxu1 %v1617_v36 }
 0x1ec   :  { %3140 = vmatpush3.msra.mxu1 %v1617_v36 }
 0x1ed   :  { %3084 = vmatmul.mubr.msk.f32.gmra.mrb[4].mxu0 %vm272_vm2, %v259_v38  ;;  %3142 = vmatmul.mubr.msk.f32.vlgmr.msra.gmra.mrb[2].mxu1 %vm272_vm2, %v257_v6 }
 0x1ee   :  { %3144 = vmatprep.mubr.msk.f32.mxu1 %vm272_vm2, %v258_v34  ;;  %3086 = vmatprep.mubr.msk.f32.mxu0 %vm272_vm2, %v260_v39 }
 0x1f1   :  { %3145 = vmatmul.mubr.msk.f32.gmra.mrb[4].mxu1 %vm272_vm2, %v259_v38  ;;  %3087 = vmatmul.mubr.msk.f32.gmra.mrb[6].mxu0 %vm272_vm2, %v261_v40 }
 0x1f2   :  { %3147 = vmatprep.mubr.msk.f32.mxu1 %vm272_vm2, %v260_v39  ;;  %3089 = vmatprep.mubr.msk.f32.mxu0 %vm272_vm2, %v262_v41 }
 0x1f5   :  { %3148 = vmatmul.mubr.msk.f32.gmra.mrb[6].mxu1 %vm272_vm2, %v261_v40  ;;  %3090 = vmatmul.mubr.msk.f32.gmra.mrb[8].mxu0 %vm272_vm2, %v263_v42 }
 0x1f6   :  { %3150 = vmatprep.mubr.msk.f32.mxu1 %vm272_vm2, %v262_v41  ;;  %3092 = vmatprep.mubr.msk.f32.mxu0 %vm272_vm2, %v264_v43 }
 0x1f9   :  { %3151 = vmatmul.mubr.msk.f32.gmra.mrb[8].mxu1 %vm272_vm2, %v263_v42  ;;  %3093 = vmatmul.mubr.msk.f32.gmra.mrb[10].mxu0 %vm272_vm2, %v265_v44 }
 0x1fa   :  { %3153 = vmatprep.mubr.msk.f32.mxu1 %vm272_vm2, %v264_v43  ;;  %3095 = vmatprep.mubr.msk.f32.mxu0 %vm272_vm2, %v266_v45 }
 0x1fd   :  { %3154 = vmatmul.mubr.msk.f32.gmra.mrb[10].mxu1 %vm272_vm2, %v265_v44  ;;  %3096 = vmatmul.mubr.msk.f32.gmra.mrb[12].mxu0 %vm272_vm2, %v267_v46 }
 0x1fe   :  { %3156 = vmatprep.mubr.msk.f32.mxu1 %vm272_vm2, %v266_v45  ;;  %3098 = vmatprep.mubr.msk.f32.mxu0 %vm272_vm2, %v268_v47 }
 0x201   :  { %3157 = vmatmul.mubr.msk.f32.gmra.mrb[12].mxu1 %vm272_vm2, %v267_v46  ;;  %3099 = vmatmul.mubr.msk.f32.gmra.mrb[14].mxu0 %vm272_vm2, %v269_v48 }
 0x202   :  { %3159 = vmatprep.mubr.msk.f32.mxu1 %vm272_vm2, %v268_v47  ;;  %3101 = vmatprep.mubr.msk.f32.mxu0 %vm272_vm2, %v270_v49 }
 0x205   :  { %3160 = vmatmul.mubr.msk.f32.gmra.mrb[14].mxu1 %vm272_vm2, %v269_v48  ;;  %3102 = vmatmul.mubr.msk.f32.gmra.mrb[16].mxu0 %vm272_vm2, %v271_v50 }
 0x206   :  { %3162 = vmatprep.mubr.msk.f32.mxu1 %vm272_vm2, %v270_v49  ;;  %786 = vmatprep.mubr.f32.mxu0 %v3527_v3 }
 0x209   :  { %3163 = vmatmul.mubr.msk.f32.gmra.mrb[16].mxu1 %vm272_vm2, %v271_v50 }
 0x20a   :  { %2147 = vmatprep.mubr.f32.mxu1 %v3527_v3 }
 0x2bc   :  { %v3924_v51 = vpop.f32.mrb[2].mxu0 }
 0x2bd   :  { %484 = vrot.lane.b32.xlu1 %v3924_v51, %s3528_s28  ;;  %v3928_v52 = vpop.f32.mrb[3].mxu0 }
 0x2be   :  { %482 = vrot.lane.b32.xlu0 %v3928_v52, %s3528_s28 }
 0x2c0   :  { %v3932_v53 = vpop.f32.mrb[4].mxu0  ;;  %v3934_v54 = vpop.f32.mrb[2].mxu1 }
 0x2c1   :  { %v3936_v55 = vpop.f32.mrb[5].mxu0  ;;  %1845 = vrot.lane.b32.xlu1 %v3934_v54, %s3528_s28  ;;  %v3940_v3 = vpop.f32.mrb[3].mxu1 }
 0x2c2   :  { %486 = vrot.lane.b32.xlu0 %v3936_v55, %s3528_s28 }
 0x2c4   :  { %v3944_v57 = vpop.f32.mrb[4].mxu1  ;;  %v3946_v58 = vpop.f32.mrb[6].mxu0 }
 0x2c5   :  { %1843 = vrot.lane.b32.xlu1 %v3940_v3, %s3528_s28  ;;  %v3950_v59 = vpop.f32.mrb[5].mxu1  ;;  %v3952_v60 = vpop.f32.mrb[7].mxu0 }
 0x2c6   :  { %1847 = vrot.lane.b32.xlu0 %v3950_v59, %s3528_s28 }
 0x2c8   :  { %v3956_v61 = vpop.f32.mrb[6].mxu1  ;;  %v3958_v62 = vpop.f32.mrb[8].mxu0 }
 0x2c9   :  { %488 = vrot.lane.b32.xlu1 %v3932_v53, %s3528_s28  ;;  %v3962_v63 = vpop.f32.mrb[7].mxu1  ;;  %v3964_v0 = vpop.f32.mrb[9].mxu0 }
 0x2ca   :  { %490 = vrot.lane.b32.xlu0 %v3952_v60, %s3528_s28 }
 0x2cc   :  { %v3968_v1 = vpop.f32.mrb[8].mxu1  ;;  %v3970_v4 = vpop.f32.mrb[10].mxu0 }
 0x2cd   :  { %1849 = vrot.lane.b32.xlu1 %v3944_v57, %s3528_s28  ;;  %v3974_v5 = vpop.f32.mrb[9].mxu1  ;;  %v3976_v7 = vpop.f32.mrb[11].mxu0 }
 0x2ce   :  { %1851 = vrot.lane.b32.xlu0 %v3962_v63, %s3528_s28 }
 0x2d0   :  { %v3980_v8 = vpop.f32.mrb[10].mxu1  ;;  %v3982_v9 = vpop.f32.mrb[12].mxu0 }
 0x2d1   :  { %492 = vrot.lane.b32.xlu1 %v3946_v58, %s3528_s28  ;;  %v3986_v10 = vpop.f32.mrb[11].mxu1  ;;  %v3988_v11 = vpop.f32.mrb[13].mxu0 }
 0x2d2   :  { %494 = vrot.lane.b32.xlu0 %v3964_v0, %s3528_s28 }
 0x2d4   :  { %v3992_v12 = vpop.f32.mrb[12].mxu1  ;;  %v3994_v13 = vpop.f32.mrb[14].mxu0 }
 0x2d5   :  { %1853 = vrot.lane.b32.xlu1 %v3956_v61, %s3528_s28  ;;  %v3998_v14 = vpop.f32.mrb[13].mxu1  ;;  %v4000_v15 = vpop.f32.mrb[15].mxu0 }
 0x2d6   :  { %1855 = vrot.lane.b32.xlu0 %v3974_v5, %s3528_s28 }
 0x2d8   :  { %v4004_v16 = vpop.f32.mrb[14].mxu1  ;;  %v4006_v17 = vpop.f32.mrb[16].mxu0 }
 0x2d9   :  { %496 = vrot.lane.b32.xlu1 %v3958_v62, %s3528_s28  ;;  %v4010_v18 = vpop.f32.mrb[15].mxu1  ;;  %v4012_v19 = vpop.f32.mrb[17].mxu0 }
 0x2da   :  { %498 = vrot.lane.b32.xlu0 %v3976_v7, %s3528_s28 }
 0x2dc   :  { %v4016_v20 = vpop.f32.mrb[16].mxu1 }
 0x2dd   :  { %1857 = vrot.lane.b32.xlu1 %v3968_v1, %s3528_s28  ;;  %v4020_v21 = vpop.f32.mrb[17].mxu1 }
 0x2de   :  { %1859 = vrot.lane.b32.xlu0 %v3986_v10, %s3528_s28 }
 0x2e1   :  { %500 = vrot.lane.b32.xlu1 %v3970_v4, %s3528_s28 }
 0x2e2   :  { %502 = vrot.lane.b32.xlu0 %v3988_v11, %s3528_s28 }
 0x2e5   :  { %1861 = vrot.lane.b32.xlu1 %v3980_v8, %s3528_s28 }
 0x2e6   :  { %1863 = vrot.lane.b32.xlu0 %v3998_v14, %s3528_s28 }
 0x2e9   :  { %504 = vrot.lane.b32.xlu1 %v3982_v9, %s3528_s28 }
 0x2ea   :  { %506 = vrot.lane.b32.xlu0 %v4000_v15, %s3528_s28 }
 0x2ed   :  { %1865 = vrot.lane.b32.xlu1 %v3992_v12, %s3528_s28 }
 0x2ee   :  { %1867 = vrot.lane.b32.xlu0 %v4010_v18, %s3528_s28 }
 0x2f1   :  { %508 = vrot.lane.b32.xlu1 %v3994_v13, %s3528_s28 }
 0x2f2   :  { %510 = vrot.lane.b32.xlu0 %v4012_v19, %s3528_s28 }
 0x2f5   :  { %1869 = vrot.lane.b32.xlu1 %v4004_v16, %s3528_s28 }
 0x2f6   :  { %1871 = vrot.lane.b32.xlu0 %v4020_v21, %s3528_s28 }
 0x2f9   :  { %512 = vrot.lane.b32.xlu1 %v4006_v17, %s3528_s28 }
 0x2fd   :  { %1873 = vrot.lane.b32.xlu1 %v4016_v20, %s3528_s28 }
 0x32f   :  { %v485_v22 = vpop.permute.xlu1 %484 }
 0x330   :  { %v531_v23 = vadd.f32 %v3924_v51, %v485_v22  ;;  %v483_v24 = vpop.permute.xlu0 %482 }
 0x331   :  { %v530_v25 = vadd.f32 %v483_v24, %v3928_v52 }
 0x332   :  { %v547_v31 = vmul.f32 0.5, %v531_v23 }
 0x333   :  { %v546_v26 = vmul.f32 0.5, %v530_v25  ;;  %v1846_v27 = vpop.permute.xlu1 %1845 }
 0x334   :  { %3389 = vtanh.f32 %v547_v31  ;;  %v1892_v28 = vadd.f32 %v3934_v54, %v1846_v27  ;;  %v487_v29 = vpop.permute.xlu0 %486 }
 0x335   :  { %v532_v30 = vadd.f32 %v487_v29, %v3936_v55  ;;  %3391 = vtanh.f32 %v546_v26 }
 0x336   :  { %v1908_v32 = vmul.f32 0.5, %v1892_v28 }
 0x337   :  { %v548_v33 = vmul.f32 0.5, %v532_v30  ;;  %v1844_v6 = vpop.permute.xlu1 %1843 }
 0x338   :  { %3393 = vtanh.f32 %v1908_v32  ;;  %v1891_v34 = vadd.f32 %v1844_v6, %v3940_v3  ;;  %v1848_v35 = vpop.permute.xlu0 %1847 }
 0x339   :  { %v1893_v36 = vadd.f32 %v1848_v35, %v3950_v59  ;;  %3395 = vtanh.f32 %v548_v33 }
 0x33a   :  { %v1907_v37 = vmul.f32 0.5, %v1891_v34 }
 0x33b   :  { %v1909_v38 = vmul.f32 0.5, %v1893_v36  ;;  %v489_v39 = vpop.permute.xlu1 %488 }
 0x33c   :  { %3397 = vtanh.f32 %v1907_v37  ;;  %v533_v40 = vadd.f32 %v3932_v53, %v489_v39  ;;  %v491_v41 = vpop.permute.xlu0 %490 }
 0x33d   :  { %v534_v42 = vadd.f32 %v491_v41, %v3952_v60  ;;  %3399 = vtanh.f32 %v1909_v38 }
 0x33e   :  { %v3390_v43 = vpop.eup %3389  ;;  %v549_v44 = vmul.f32 0.5, %v533_v40 }
 0x33f   :  { %v579_v45 = vmul.f32 0.5, %v3390_v43  ;;  %v550_v46 = vmul.f32 0.5, %v534_v42  ;;  %v1850_v47 = vpop.permute.xlu1 %1849  ;;  %v3392_v50 = vpop.eup %3391 }
 0x340   :  { %3401 = vtanh.f32 %v549_v44  ;;  %v1894_v48 = vadd.f32 %v3944_v57, %v1850_v47  ;;  %v1852_v49 = vpop.permute.xlu0 %1851  ;;  %v578_v23 = vmul.f32 0.5, %v3392_v50 }
 0x341   :  { %v595_v51 = vadd.f32 0.5, %v579_v45  ;;  %v1895_v52 = vadd.f32 %v1852_v49, %v3962_v63  ;;  %3403 = vtanh.f32 %v550_v46 }
 0x342   :  { %v3394_v54 = vpop.eup %3393  ;;  %v1910_v55 = vmul.f32 0.5, %v1894_v48  ;;  %v594_v6 = vadd.f32 0.5, %v578_v23 }
 0x343   :  { %v1940_v53 = vmul.f32 0.5, %v3394_v54  ;;  %v1911_v3 = vmul.f32 0.5, %v1895_v52  ;;  %v493_v56 = vpop.permute.xlu1 %492  ;;  %617 = vperm.xlu1 %3291, %v595_v51   ;;  %v3396_v22 = vpop.eup %3395 }
 0x344   :  { %3405 = vtanh.f32 %v1910_v55  ;;  %v535_v59 = vadd.f32 %v3946_v58, %v493_v56  ;;  %v495_v60 = vpop.permute.xlu0 %494  ;;  %v580_v32 = vmul.f32 0.5, %v3396_v22 }
 0x345   :  { %v536_v57 = vadd.f32 %v495_v60, %v3964_v0  ;;  %v1956_v24 = vadd.f32 0.5, %v1940_v53  ;;  %3407 = vtanh.f32 %v1911_v3 }
 0x346   :  { %v3398_v25 = vpop.eup %3397  ;;  %v551_v31 = vmul.f32 0.5, %v535_v59  ;;  %v596_v40 = vadd.f32 0.5, %v580_v32 }
 0x347   :  { %v1939_v26 = vmul.f32 0.5, %v3398_v25  ;;  %v552_v63 = vmul.f32 0.5, %v536_v57  ;;  %v1854_v27 = vpop.permute.xlu1 %1853  ;;  %1978 = vperm.xlu0 %3292, %v1956_v24   ;;  %v3400_v30 = vpop.eup %3399 }
 0x348   :  { %3409 = vtanh.f32 %v551_v31  ;;  %v1896_v28 = vadd.f32 %v3956_v61, %v1854_v27  ;;  %v1856_v29 = vpop.permute.xlu0 %1855  ;;  %v1941_v41 = vmul.f32 0.5, %v3400_v30 }
 0x349   :  { %v1955_v58 = vadd.f32 0.5, %v1939_v26  ;;  %v1897_v33 = vadd.f32 %v1856_v29, %v3974_v5  ;;  %3411 = vtanh.f32 %v552_v63 }
 0x34a   :  { %v3402_v34 = vpop.eup %3401  ;;  %v1912_v0 = vmul.f32 0.5, %v1896_v28  ;;  %v1957_v50 = vadd.f32 0.5, %v1941_v41 }
 0x34b   :  { %v581_v35 = vmul.f32 0.5, %v3402_v34  ;;  %v1913_v36 = vmul.f32 0.5, %v1897_v33  ;;  %v497_v37 = vpop.permute.xlu1 %496  ;;  %1973 = vperm.xlu1 %3291, %v1955_v58   ;;  %612 = vperm.xlu0 %3292, %v594_v6   ;;  %v3404_v61 = vpop.eup %3403 }
 0x34c   :  { %3413 = vtanh.f32 %v1912_v0  ;;  %v537_v38 = vadd.f32 %v3958_v62, %v497_v37  ;;  %v499_v39 = vpop.permute.xlu0 %498  ;;  %v582_v51 = vmul.f32 0.5, %v3404_v61 }
 0x34d   :  { %v597_v42 = vadd.f32 0.5, %v581_v35  ;;  %v538_v43 = vadd.f32 %v499_v39, %v3976_v7  ;;  %3415 = vtanh.f32 %v1913_v36 }
 0x34e   :  { %v3406_v5 = vpop.eup %3405  ;;  %v553_v44 = vmul.f32 0.5, %v537_v38  ;;  %v598_v22 = vadd.f32 0.5, %v582_v51 }
 0x34f   :  { %v1942_v45 = vmul.f32 0.5, %v3406_v5  ;;  %v554_v46 = vmul.f32 0.5, %v538_v43  ;;  %v1858_v47 = vpop.permute.xlu1 %1857  ;;  %627 = vperm.xlu0 %3292, %v597_v42   ;;  %622 = vperm.xlu1 %3291, %v596_v40   ;;  %v3408_v62 = vpop.eup %3407 }
 0x350   :  { %3417 = vtanh.f32 %v553_v44  ;;  %v1898_v48 = vadd.f32 %v3968_v1, %v1858_v47  ;;  %v1860_v49 = vpop.permute.xlu0 %1859  ;;  %v1943_v23 = vmul.f32 0.5, %v3408_v62 }
 0x351   :  { %v1958_v52 = vadd.f32 0.5, %v1942_v45  ;;  %v1899_v54 = vadd.f32 %v1860_v49, %v3986_v10  ;;  %3419 = vtanh.f32 %v554_v46 }
 0x352   :  { %v3410_v55 = vpop.eup %3409  ;;  %v1914_v7 = vmul.f32 0.5, %v1898_v48  ;;  %v1959_v29 = vadd.f32 0.5, %v1943_v23 }
 0x353   :  { %v583_v53 = vmul.f32 0.5, %v3410_v55  ;;  %v1915_v3 = vmul.f32 0.5, %v1899_v54  ;;  %v501_v56 = vpop.permute.xlu1 %500  ;;  %1988 = vperm.xlu0 %3292, %v1958_v52   ;;  %1983 = vperm.xlu1 %3291, %v1957_v50   ;;  %v3412_v1 = vpop.eup %3411 }
 0x354   :  { %3421 = vtanh.f32 %v1914_v7  ;;  %v539_v59 = vadd.f32 %v3970_v4, %v501_v56  ;;  %v503_v60 = vpop.permute.xlu0 %502  ;;  %v584_v30 = vmul.f32 0.5, %v3412_v1 }
 0x355   :  { %v599_v57 = vadd.f32 0.5, %v583_v53  ;;  %v540_v24 = vadd.f32 %v503_v60, %v3988_v11  ;;  %3423 = vtanh.f32 %v1915_v3 }
 0x356   :  { %v3414_v25 = vpop.eup %3413  ;;  %v555_v10 = vmul.f32 0.5, %v539_v59  ;;  %v600_v37 = vadd.f32 0.5, %v584_v30 }
 0x357   :  { %v1944_v31 = vmul.f32 0.5, %v3414_v25  ;;  %v556_v26 = vmul.f32 0.5, %v540_v24  ;;  %v1862_v63 = vpop.permute.xlu1 %1861  ;;  %637 = vperm.xlu0 %3292, %v599_v57   ;;  %632 = vperm.xlu1 %3291, %v598_v22   ;;  %v3416_v4 = vpop.eup %3415 }
 0x358   :  { %3425 = vtanh.f32 %v555_v10  ;;  %v1900_v27 = vadd.f32 %v3980_v8, %v1862_v63  ;;  %v1864_v28 = vpop.permute.xlu0 %1863  ;;  %v1945_v38 = vmul.f32 0.5, %v3416_v4 }
 0x359   :  { %v1960_v32 = vadd.f32 0.5, %v1944_v31  ;;  %v1901_v58 = vadd.f32 %v1864_v28, %v3998_v14  ;;  %3427 = vtanh.f32 %v556_v26 }
 0x35a   :  { %v3418_v33 = vpop.eup %3417  ;;  %v1916_v11 = vmul.f32 0.5, %v1900_v27  ;;  %v1961_v45 = vadd.f32 0.5, %v1945_v38 }
 0x35b   :  { %v585_v6 = vmul.f32 0.5, %v3418_v33  ;;  %v1917_v34 = vmul.f32 0.5, %v1901_v58  ;;  %v505_v0 = vpop.permute.xlu1 %504  ;;  %1998 = vperm.xlu0 %3292, %v1960_v32   ;;  %1993 = vperm.xlu1 %3291, %v1959_v29   ;;  %v3420_v8 = vpop.eup %3419 }
 0x35c   :  { %3429 = vtanh.f32 %v1916_v11  ;;  %v541_v35 = vadd.f32 %v3982_v9, %v505_v0  ;;  %v507_v36 = vpop.permute.xlu0 %506  ;;  %v586_v46 = vmul.f32 0.5, %v3420_v8 }
 0x35d   :  { %v601_v39 = vadd.f32 0.5, %v585_v6  ;;  %v542_v61 = vadd.f32 %v507_v36, %v4000_v15  ;;  %3431 = vtanh.f32 %v1917_v34 }
 0x35e   :  { %v3422_v40 = vpop.eup %3421  ;;  %v557_v14 = vmul.f32 0.5, %v541_v35  ;;  %v602_v55 = vadd.f32 0.5, %v586_v46 }
 0x35f   :  { %v1946_v41 = vmul.f32 0.5, %v3422_v40  ;;  %v558_v42 = vmul.f32 0.5, %v542_v61  ;;  %v1866_v43 = vpop.permute.xlu1 %1865  ;;  %647 = vperm.xlu0 %3292, %v601_v39   ;;  %642 = vperm.xlu1 %3291, %v600_v37   ;;  %v3424_v9 = vpop.eup %3423 }
 0x360   :  { %3433 = vtanh.f32 %v557_v14  ;;  %v1902_v5 = vadd.f32 %v3992_v12, %v1866_v43  ;;  %v1868_v44 = vpop.permute.xlu0 %1867  ;;  %v1947_v7 = vmul.f32 0.5, %v3424_v9 }
 0x361   :  { %v1962_v47 = vadd.f32 0.5, %v1946_v41  ;;  %v1903_v48 = vadd.f32 %v1868_v44, %v4010_v18  ;;  %3435 = vtanh.f32 %v558_v42 }
 0x362   :  { %v3426_v49 = vpop.eup %3425  ;;  %v1918_v15 = vmul.f32 0.5, %v1902_v5  ;;  %v1963_v57 = vadd.f32 0.5, %v1947_v7 }
 0x363   :  { %v587_v62 = vmul.f32 0.5, %v3426_v49  ;;  %v1919_v50 = vmul.f32 0.5, %v1903_v48  ;;  %v509_v51 = vpop.permute.xlu1 %508  ;;  %2008 = vperm.xlu0 %3292, %v1962_v47   ;;  %2003 = vperm.xlu1 %3291, %v1961_v45   ;;  %v3428_v12 = vpop.eup %3427 }
 0x364   :  { %3437 = vtanh.f32 %v1918_v15  ;;  %v543_v52 = vadd.f32 %v3994_v13, %v509_v51  ;;  %v511_v54 = vpop.permute.xlu0 %510  ;;  %v588_v24 = vmul.f32 0.5, %v3428_v12  ;;  %v3461_v51 = vld [vmem:[%s4987_s0 + $0x10] sm:$0xff] }
 0x365   :  { %v603_v53 = vadd.f32 0.5, %v587_v62  ;;  %v544_v3 = vadd.f32 %v511_v54, %v4012_v19  ;;  %3439 = vtanh.f32 %v1919_v50  ;;  %v3462_v54 = vld [vmem:[%s4987_s0 + $0x18] sm:$0xff] }
 0x366   :  { %v3430_v56 = vpop.eup %3429  ;;  %v559_v18 = vmul.f32 0.5, %v543_v52 }
 0x367   :  { %v1948_v59 = vmul.f32 0.5, %v3430_v56  ;;  %v560_v60 = vmul.f32 0.5, %v544_v3  ;;  %v1870_v1 = vpop.permute.xlu1 %1869  ;;  %657 = vperm.xlu0 %3292, %v603_v53   ;;  %652 = vperm.xlu1 %3291, %v602_v55   ;;  %v3432_v13 = vpop.eup %3431  ;;  %v3463_v55 = vld [vmem:[%s4987_s0 + $0x110] sm:$0xff]  ;;  %v3464_v53 = vld [vmem:[%s4987_s0 + $0x118] sm:$0xff] }
 0x368   :  { %3441 = vtanh.f32 %v559_v18  ;;  %v1904_v22 = vadd.f32 %v4004_v16, %v1870_v1  ;;  %v1872_v23 = vpop.permute.xlu0 %1871  ;;  %v604_v16 = vadd.f32 0.5, %v588_v24  ;;  %v1949_v29 = vmul.f32 0.5, %v3432_v13  ;;  %v3466_v1 = vld [vmem:[%s4987_s0 + $0x108] sm:$0xff] }
 0x369   :  { %v1964_v25 = vadd.f32 0.5, %v1948_v59  ;;  %v1905_v10 = vadd.f32 %v1872_v23, %v4020_v21  ;;  %3443 = vtanh.f32 %v560_v60  ;;  %v3465_v59 = vld [vmem:[%s4987_s0 + $0x100] sm:$0xff] }
 0x36a   :  { %v3434_v31 = vpop.eup %3433  ;;  %v1920_v19 = vmul.f32 0.5, %v1904_v22  ;;  %v1965_v34 = vadd.f32 0.5, %v1949_v29  ;;  %v3467_v23 = vld [vmem:[%s4987_s0] sm:$0xff]  ;;  %v3471_v29 = vld [vmem:[%s4987_s0 + $0x30] sm:$0xff] }
 0x36b   :  { %v589_v26 = vmul.f32 0.5, %v3434_v31  ;;  %v1921_v63 = vmul.f32 0.5, %v1905_v10  ;;  %v513_v27 = vpop.permute.xlu1 %512  ;;  %2018 = vperm.xlu0 %3292, %v1964_v25   ;;  %2013 = vperm.xlu1 %3291, %v1963_v57   ;;  %v3436_v4 = vpop.eup %3435  ;;  %v3468_v57 = vld [vmem:[%s4987_s0 + $0x8] sm:$0xff] }
 0x36c   :  { %3445 = vtanh.f32 %v1920_v19  ;;  %v545_v28 = vadd.f32 %v4006_v17, %v513_v27  ;;  %v590_v0 = vmul.f32 0.5, %v3436_v4  ;;  %v3469_v27 = vld [vmem:[%s4987_s0 + $0x20] sm:$0xff]  ;;  %v3470_v4 = vld [vmem:[%s4987_s0 + $0x28] sm:$0xff] }
 0x36d   :  { %v605_v30 = vadd.f32 0.5, %v589_v26  ;;  %3447 = vtanh.f32 %v1921_v63 }
 0x36e   :  { %v3438_v32 = vpop.eup %3437  ;;  %v561_v58 = vmul.f32 0.5, %v545_v28  ;;  %v606_v38 = vadd.f32 0.5, %v590_v0 }
 0x36f   :  { %v1950_v33 = vmul.f32 0.5, %v3438_v32  ;;  %v1874_v21 = vpop.permute.xlu1 %1873  ;;  %667 = vperm.xlu0 %3292, %v605_v30   ;;  %662 = vperm.xlu1 %3291, %v604_v16   ;;  %v3440_v6 = vpop.eup %3439  ;;  %v3472_v32 = vld [vmem:[%s4987_s0 + $0x38] sm:$0xff] }
 0x370   :  { %3449 = vtanh.f32 %v561_v58  ;;  %v1906_v11 = vadd.f32 %v4016_v20, %v1874_v21  ;;  %v1951_v39 = vmul.f32 0.5, %v3440_v6 }
 0x371   :  { %v1966_v35 = vadd.f32 0.5, %v1950_v33 }
 0x372   :  { %v3442_v36 = vpop.eup %3441  ;;  %v1922_v17 = vmul.f32 0.5, %v1906_v11  ;;  %v1967_v20 = vadd.f32 0.5, %v1951_v39 }
 0x373   :  { %v591_v8 = vmul.f32 0.5, %v3442_v36  ;;  %2028 = vperm.xlu0 %3292, %v1966_v35   ;;  %2023 = vperm.xlu1 %3291, %v1965_v34   ;;  %v3444_v37 = vpop.eup %3443  ;;  %v3473_v34 = vld [vmem:[%s4987_s0 + $0x120] sm:$0xff]  ;;  %v3474_v35 = vld [vmem:[%s4987_s0 + $0x128] sm:$0xff] }
 0x374   :  { %3451 = vtanh.f32 %v1922_v17  ;;  %v592_v42 = vmul.f32 0.5, %v3444_v37  ;;  %v3475_v17 = vld [vmem:[%s4987_s0 + $0x130] sm:$0xff]  ;;  %v3476_v37 = vld [vmem:[%s4987_s0 + $0x138] sm:$0xff] }
 0x375   :  { %v607_v61 = vadd.f32 0.5, %v591_v8 }
 0x376   :  { %v3446_v40 = vpop.eup %3445  ;;  %v608_v9 = vadd.f32 0.5, %v592_v42  ;;  %v3478_v42 = vld [vmem:[%s4987_s0 + $0x48] sm:$0xff] }
 0x377   :  { %v1952_v14 = vmul.f32 0.5, %v3446_v40  ;;  %677 = vperm.xlu0 %3292, %v607_v61   ;;  %672 = vperm.xlu1 %3291, %v606_v38   ;;  %v3448_v41 = vpop.eup %3447 }
 0x378   :  { %v1953_v45 = vmul.f32 0.5, %v3448_v41  ;;  %v3477_v41 = vld [vmem:[%s4987_s0 + $0x40] sm:$0xff] }
 0x379   :  { %v1968_v43 = vadd.f32 0.5, %v1952_v14 }
 0x37a   :  { %v3450_v5 = vpop.eup %3449  ;;  %v1969_v49 = vadd.f32 0.5, %v1953_v45 }
 0x37b   :  { %v593_v44 = vmul.f32 0.5, %v3450_v5  ;;  %2038 = vperm.xlu0 %3292, %v1968_v43   ;;  %2033 = vperm.xlu1 %3291, %v1967_v20   ;;  %v3479_v5 = vld [vmem:[%s4987_s0 + $0x50] sm:$0xff] }
 0x37d   :  { %v609_v46 = vadd.f32 0.5, %v593_v44 }
 0x37e   :  { %v3452_v47 = vpop.eup %3451 }
 0x37f   :  { %v1954_v48 = vmul.f32 0.5, %v3452_v47  ;;  %687 = vperm.xlu0 %3292, %v609_v46   ;;  %682 = vperm.xlu1 %3291, %v608_v9   ;;  %v3480_v9 = vld [vmem:[%s4987_s0 + $0x58] sm:$0xff] }
 0x381   :  { %v1970_v15 = vadd.f32 0.5, %v1954_v48 }
 0x383   :  { %2048 = vperm.xlu0 %3292, %v1970_v15   ;;  %2043 = vperm.xlu1 %3291, %v1969_v49   ;;  %v3481_v15 = vld [vmem:[%s4987_s0 + $0x140] sm:$0xff] }
 0x3c2   :  { %v618_v62 = vpop.permute.xlu1 %617 }
 0x3c3   :  { %v4087_v52 = vmul.f32 %v3461_v51, %v618_v62  ;;  %v4092_v12 = vmul.f32 %v3462_v54, %v618_v62  ;;  %v3483_v54 = vld [vmem:[%s4987_s0 + $0x150] sm:$0xff] }
 0x3c6   :  { %v1979_v50 = vpop.permute.xlu0 %1978 }
 0x3c7   :  { %v4097_v7 = vmul.f32 %v3463_v55, %v1979_v50  ;;  %v4102_v3 = vmul.f32 %v3464_v53, %v1979_v50  ;;  %v3482_v50 = vld [vmem:[%s4987_s0 + $0x148] sm:$0xff]  ;;  %v3484_v53 = vld [vmem:[%s4987_s0 + $0x158] sm:$0xff] }
 0x3c9   :  { %5011 = vst [vmem:[#allocation2_spill] sm:$0xff] %v4102_v3 }
 0x3ca   :  { %v1974_v56 = vpop.permute.xlu1 %1973  ;;  %v613_v18 = vpop.permute.xlu0 %612 }
 0x3cb   :  { %v4107_v60 = vmul.f32 %v3465_v59, %v1974_v56  ;;  %v4112_v22 = vmul.f32 %v3466_v1, %v1974_v56  ;;  %v4117_v13 = vmul.f32 %v3467_v23, %v613_v18  ;;  %v4122_v24 = vmul.f32 %v3468_v57, %v613_v18  ;;  %v3485_v57 = vld [vmem:[%s4987_s0 + $0x60] sm:$0xff] }
 0x3cd   :  { %5012 = vst [vmem:[#allocation3_spill] sm:$0xff] %v4112_v22  ;;  %v3247_v25 = vpack.c.bf16 %v4097_v7, %v4107_v60  ;;  %v3191_v10 = vpack.c.bf16 %v4087_v52, %v4117_v13  ;;  %v3189_v31 = vpack.c.bf16 %v4092_v12, %v4122_v24  ;;  %v3245_v19 = vpack.c.bf16 %v4102_v3, %v4112_v22 }
 0x3ce   :  { %v623_v26 = vpop.permute.xlu1 %622  ;;  %v628_v63 = vpop.permute.xlu0 %627 }
 0x3cf   :  { %v4135_v28 = vmul.f32 %v3469_v27, %v623_v26  ;;  %v4140_v16 = vmul.f32 %v3470_v4, %v623_v26  ;;  %v4145_v30 = vmul.f32 %v3471_v29, %v628_v63  ;;  %v4150_v58 = vmul.f32 %v3472_v32, %v628_v63  ;;  %3190 = vmatprep.subr.bf16.mxu0 %v3189_v31  ;;  %v3488_v63 = vld [vmem:[%s4987_s0 + $0x78] sm:$0xff] }
 0x3d0   :  { %3246 = vmatprep.subr.bf16.mxu1 %v3245_v19  ;;  %3192 = vmatpush1.bf16.msra.mxu0 %v3191_v10  ;;  %v3486_v10 = vld [vmem:[%s4987_s0 + $0x68] sm:$0xff]  ;;  %v3487_v19 = vld [vmem:[%s4987_s0 + $0x70] sm:$0xff] }
 0x3d1   :  { %v3195_v33 = vpack.c.bf16 %v4145_v30, %v4135_v28  ;;  %3248 = vmatpush1.bf16.msra.mxu1 %v3247_v25  ;;  %v3193_v6 = vpack.c.bf16 %v4150_v58, %v4140_v16 }
 0x3d2   :  { %v1984_v21 = vpop.permute.xlu1 %1983  ;;  %v1989_v11 = vpop.permute.xlu0 %1988 }
 0x3d3   :  { %v4159_v0 = vmul.f32 %v3473_v34, %v1984_v21  ;;  %v4164_v36 = vmul.f32 %v3474_v35, %v1984_v21  ;;  %v4169_v8 = vmul.f32 %v3475_v17, %v1989_v11  ;;  %v4174_v38 = vmul.f32 %v3476_v37, %v1989_v11  ;;  %3194 = vmatprep.subr.bf16.mxu0 %v3193_v6  ;;  %v3489_v21 = vld [vmem:[%s4987_s0 + $0x160] sm:$0xff]  ;;  %v3490_v6 = vld [vmem:[%s4987_s0 + $0x168] sm:$0xff]  ;;  %v3491_v35 = vld [vmem:[%s4987_s0 + $0x170] sm:$0xff] }
 0x3d4   :  { %3196 = vmatpush1.bf16.msra.mxu0 %v3195_v33  ;;  %v3492_v37 = vld [vmem:[%s4987_s0 + $0x178] sm:$0xff] }
 0x3d5   :  { %5013 = vst [vmem:[#allocation4_spill] sm:$0xff] %v4164_v36  ;;  %5014 = vst [vmem:[#allocation5_spill] sm:$0xff] %v4174_v38  ;;  %v3251_v39 = vpack.c.bf16 %v4169_v8, %v4159_v0  ;;  %v3249_v14 = vpack.c.bf16 %v4174_v38, %v4164_v36 }
 0x3d6   :  { %v633_v61 = vpop.permute.xlu1 %632  ;;  %v638_v40 = vpop.permute.xlu0 %637 }
 0x3d7   :  { %v4183_v20 = vmul.f32 %v3477_v41, %v633_v61  ;;  %v4188_v43 = vmul.f32 %v3478_v42, %v633_v61  ;;  %v4193_v44 = vmul.f32 %v3479_v5, %v638_v40  ;;  %v4198_v45 = vmul.f32 %v3480_v9, %v638_v40  ;;  %3250 = vmatprep.subr.bf16.mxu1 %v3249_v14  ;;  %v3493_v42 = vld [vmem:[%s4987_s0 + $0x80] sm:$0xff]  ;;  %v3494_v9 = vld [vmem:[%s4987_s0 + $0x88] sm:$0xff] }
 0x3d8   :  { %3252 = vmatpush1.bf16.msra.mxu1 %v3251_v39 }
 0x3d9   :  { %5015 = vst [vmem:[#allocation6_spill] sm:$0xff] %v4188_v43  ;;  %v3199_v46 = vpack.c.bf16 %v4193_v44, %v4183_v20  ;;  %v3197_v49 = vpack.c.bf16 %v4198_v45, %v4188_v43 }
 0x3da   :  { %v1994_v47 = vpop.permute.xlu1 %1993  ;;  %v1999_v48 = vpop.permute.xlu0 %1998 }
 0x3db   :  { %v4207_v62 = vmul.f32 %v3481_v15, %v1994_v47  ;;  %v4212_v51 = vmul.f32 %v3482_v50, %v1994_v47  ;;  %v4217_v55 = vmul.f32 %v3483_v54, %v1999_v48  ;;  %v4222_v56 = vmul.f32 %v3484_v53, %v1999_v48  ;;  %3198 = vmatprep.subr.bf16.mxu0 %v3197_v49  ;;  %v3495_v47 = vld [vmem:[%s4987_s0 + $0x90] sm:$0xff]  ;;  %v3496_v49 = vld [vmem:[%s4987_s0 + $0x98] sm:$0xff] }
 0x3dc   :  { %3200 = vmatpush1.bf16.msra.mxu0 %v3199_v46 }
 0x3dd   :  { %5016 = vst [vmem:[#allocation7_spill] sm:$0xff] %v4212_v51  ;;  %5017 = vst [vmem:[#allocation8_spill] sm:$0xff] %v4222_v56  ;;  %v3255_v18 = vpack.c.bf16 %v4217_v55, %v4207_v62  ;;  %v3253_v23 = vpack.c.bf16 %v4222_v56, %v4212_v51 }
 0x3de   :  { %v643_v59 = vpop.permute.xlu1 %642  ;;  %v648_v1 = vpop.permute.xlu0 %647 }
 0x3df   :  { %v4231_v25 = vmul.f32 %v3485_v57, %v643_v59  ;;  %v4236_v31 = vmul.f32 %v3486_v10, %v643_v59  ;;  %v4241_v26 = vmul.f32 %v3487_v19, %v648_v1  ;;  %v4246_v27 = vmul.f32 %v3488_v63, %v648_v1  ;;  %3254 = vmatprep.subr.bf16.mxu1 %v3253_v23  ;;  %v3497_v59 = vld [vmem:[%s4987_s0 + $0x180] sm:$0xff]  ;;  %v3498_v23 = vld [vmem:[%s4987_s0 + $0x188] sm:$0xff]  ;;  %v3499_v10 = vld [vmem:[%s4987_s0 + $0x190] sm:$0xff] }
 0x3e0   :  { %3256 = vmatpush1.bf16.msra.mxu1 %v3255_v18  ;;  %v3500_v63 = vld [vmem:[%s4987_s0 + $0x198] sm:$0xff] }
 0x3e1   :  { %v3203_v4 = vpack.c.bf16 %v4241_v26, %v4231_v25  ;;  %v3201_v33 = vpack.c.bf16 %v4246_v27, %v4236_v31 }
 0x3e2   :  { %v2004_v29 = vpop.permute.xlu1 %2003  ;;  %v2009_v32 = vpop.permute.xlu0 %2008 }
 0x3e3   :  { %v4255_v11 = vmul.f32 %v3489_v21, %v2004_v29  ;;  %v4260_v34 = vmul.f32 %v3490_v6, %v2004_v29  ;;  %v4265_v17 = vmul.f32 %v3491_v35, %v2009_v32  ;;  %v4270_v39 = vmul.f32 %v3492_v37, %v2009_v32  ;;  %3202 = vmatprep.subr.bf16.mxu0 %v3201_v33  ;;  %v3501_v6 = vld [vmem:[%s4987_s0 + $0xa0] sm:$0xff]  ;;  %v3502_v37 = vld [vmem:[%s4987_s0 + $0xa8] sm:$0xff] }
 0x3e4   :  { %3204 = vmatpush1.bf16.msra.mxu0 %v3203_v4 }
 0x3e5   :  { %5018 = vst [vmem:[#allocation9_spill] sm:$0xff] %v4260_v34  ;;  %5019 = vst [vmem:[#allocation10_spill] sm:$0xff] %v4270_v39  ;;  %v3259_v61 = vpack.c.bf16 %v4265_v17, %v4255_v11  ;;  %v3257_v41 = vpack.c.bf16 %v4270_v39, %v4260_v34 }
 0x3e6   :  { %v653_v40 = vpop.permute.xlu1 %652  ;;  %v658_v14 = vpop.permute.xlu0 %657 }
 0x3e7   :  { %v4279_v5 = vmul.f32 %v3493_v42, %v653_v40  ;;  %v4284_v46 = vmul.f32 %v3494_v9, %v653_v40  ;;  %v4289_v48 = vmul.f32 %v3495_v47, %v658_v14  ;;  %v4294_v15 = vmul.f32 %v3496_v49, %v658_v14  ;;  %3258 = vmatprep.subr.bf16.mxu1 %v3257_v41  ;;  %v3503_v40 = vld [vmem:[%s4987_s0 + $0xb0] sm:$0xff]  ;;  %v3504_v41 = vld [vmem:[%s4987_s0 + $0xb8] sm:$0xff] }
 0x3e8   :  { %3260 = vmatpush1.bf16.msra.mxu1 %v3259_v61 }
 0x3e9   :  { %5020 = vst [vmem:[#allocation11_spill] sm:$0xff] %v4284_v46  ;;  %v3207_v50 = vpack.c.bf16 %v4289_v48, %v4279_v5  ;;  %v3205_v18 = vpack.c.bf16 %v4294_v15, %v4284_v46 }
 0x3ea   :  { %v2014_v54 = vpop.permute.xlu1 %2013  ;;  %v2019_v53 = vpop.permute.xlu0 %2018 }
 0x3eb   :  { %v4303_v1 = vmul.f32 %v3497_v59, %v2014_v54  ;;  %v4308_v57 = vmul.f32 %v3498_v23, %v2014_v54  ;;  %v4313_v19 = vmul.f32 %v3499_v10, %v2019_v53  ;;  %v4318_v4 = vmul.f32 %v3500_v63, %v2019_v53  ;;  %3206 = vmatprep.subr.bf16.mxu0 %v3205_v18  ;;  %v3505_v54 = vld [vmem:[%s4987_s0 + $0x1a0] sm:$0xff]  ;;  %v3506_v18 = vld [vmem:[%s4987_s0 + $0x1a8] sm:$0xff]  ;;  %v3507_v23 = vld [vmem:[%s4987_s0 + $0x1b0] sm:$0xff] }
 0x3ec   :  { %3208 = vmatpush1.bf16.msra.mxu0 %v3207_v50  ;;  %v3508_v63 = vld [vmem:[%s4987_s0 + $0x1b8] sm:$0xff] }
 0x3ed   :  { %5021 = vst [vmem:[#allocation12_spill] sm:$0xff] %v4308_v57  ;;  %v3263_v29 = vpack.c.bf16 %v4313_v19, %v4303_v1  ;;  %v3261_v21 = vpack.c.bf16 %v4318_v4, %v4308_v57 }
 0x3ee   :  { %v663_v32 = vpop.permute.xlu1 %662  ;;  %v668_v33 = vpop.permute.xlu0 %667 }
 0x3ef   :  { %v4327_v35 = vmul.f32 %v3501_v6, %v663_v32  ;;  %v4332_v61 = vmul.f32 %v3502_v37, %v663_v32  ;;  %v4337_v14 = vmul.f32 %v3503_v40, %v668_v33  ;;  %v4342_v42 = vmul.f32 %v3504_v41, %v668_v33  ;;  %3262 = vmatprep.subr.bf16.mxu1 %v3261_v21 }
 0x3f0   :  { %3264 = vmatpush1.bf16.msra.mxu1 %v3263_v29  ;;  %v814_v32 = vmax.f32 %v4122_v24, %v4140_v16  ;;  %v815_v21 = vmax.f32 %v4092_v12, %v4150_v58  ;;  %v2175_v6 = vmax.f32 %v4112_v22, %v4164_v36 }
 0x3f1   :  { %v3211_v9 = vpack.c.bf16 %v4337_v14, %v4327_v35  ;;  %v3209_v50 = vpack.c.bf16 %v4342_v42, %v4332_v61 }
 0x3f2   :  { %v2024_v47 = vpop.permute.xlu1 %2023  ;;  %v2029_v49 = vpop.permute.xlu0 %2028  ;;  %v816_v37 = vmax.f32 %v814_v32, %v4188_v43  ;;  %v817_v2 = vmax.f32 %v815_v21, %v4198_v45 }
 0x3f3   :  { %v4351_v53 = vmul.f32 %v3505_v54, %v2024_v47  ;;  %v4356_v59 = vmul.f32 %v3506_v18, %v2024_v47  ;;  %v4361_v10 = vmul.f32 %v3507_v23, %v2029_v49  ;;  %v4366_v29 = vmul.f32 %v3508_v63, %v2029_v49  ;;  %3210 = vmatprep.subr.bf16.mxu0 %v3209_v50  ;;  %v3509_v49 = vld [vmem:[%s4987_s0 + $0xc0] sm:$0xff]  ;;  %v3511_v18 = vld [vmem:[%s4987_s0 + $0xd0] sm:$0xff]  ;;  %v3512_v63 = vld [vmem:[%s4987_s0 + $0xd8] sm:$0xff] }
 0x3f4   :  { %3212 = vmatpush1.bf16.msra.mxu0 %v3211_v9  ;;  %v3510_v9 = vld [vmem:[%s4987_s0 + $0xc8] sm:$0xff]  ;;  %v819_v22 = vmax.f32 %v817_v2, %v4246_v27  ;;  %v3515_v2 = vld [vmem:[%s4987_s0 + $0x1d0] sm:$0xff] }
 0x3f5   :  { %5022 = vst [vmem:[#allocation13_spill] sm:$0xff] %v4356_v59  ;;  %5023 = vst [vmem:[#allocation14_spill] sm:$0xff] %v4366_v29  ;;  %v3267_v33 = vpack.c.bf16 %v4361_v10, %v4351_v53  ;;  %v3265_v47 = vpack.c.bf16 %v4366_v29, %v4356_v59 }
 0x3f6   :  { %v673_v40 = vpop.permute.xlu1 %672  ;;  %v678_v41 = vpop.permute.xlu0 %677 }
 0x3f7   :  { %v4382_v50 = vmul.f32 %v3509_v49, %v673_v40  ;;  %v4387_v54 = vmul.f32 %v3510_v9, %v673_v40  ;;  %v4392_v23 = vmul.f32 %v3511_v18, %v678_v41  ;;  %v4397_v32 = vmul.f32 %v3512_v63, %v678_v41  ;;  %3266 = vmatprep.subr.bf16.mxu1 %v3265_v47 }
 0x3f8   :  { %v2176_v49 = vmax.f32 %v4102_v3, %v4174_v38  ;;  %v818_v40 = vmax.f32 %v816_v37, %v4236_v31  ;;  %v2177_v9 = vmax.f32 %v2175_v6, %v4212_v51  ;;  %3268 = vmatpush1.bf16.msra.mxu1 %v3267_v33  ;;  %v3513_v37 = vld [vmem:[%s4987_s0 + $0x1c0] sm:$0xff]  ;;  %v3514_v33 = vld [vmem:[%s4987_s0 + $0x1c8] sm:$0xff]  ;;  %v821_v51 = vmax.f32 %v819_v22, %v4294_v15 }
 0x3f9   :  { %5024 = vst [vmem:[#allocation15_spill] sm:$0xff] %v4387_v54  ;;  %v3215_v18 = vpack.c.bf16 %v4392_v23, %v4382_v50  ;;  %v3213_v21 = vpack.c.bf16 %v4397_v32, %v4387_v54 }
 0x3fa   :  { %v2178_v36 = vmax.f32 %v2176_v49, %v4222_v56  ;;  %v820_v41 = vmax.f32 %v818_v40, %v4284_v46  ;;  %v2034_v63 = vpop.permute.xlu1 %2033  ;;  %v2039_v43 = vpop.permute.xlu0 %2038  ;;  %v3516_v40 = vld [vmem:[%s4987_s0 + $0x1d8] sm:$0xff]  ;;  %v823_v3 = vmax.f32 %v821_v51, %v4342_v42 }
 0x3fb   :  { %v4414_v6 = vmul.f32 %v3513_v37, %v2034_v63  ;;  %v4419_v47 = vmul.f32 %v3514_v33, %v2034_v63  ;;  %v4424_v49 = vmul.f32 %v3515_v2, %v2039_v43  ;;  %v4429_v56 = vmul.f32 %v3516_v40, %v2039_v43  ;;  %3214 = vmatprep.subr.bf16.mxu0 %v3213_v21  ;;  %v3520_v21 = vld [vmem:[%s4987_s0 + $0xf8] sm:$0xff] }
 0x3fc   :  { %v2179_v37 = vmax.f32 %v2177_v9, %v4260_v34  ;;  %v822_v38 = vmax.f32 %v820_v41, %v4332_v61  ;;  %v2180_v63 = vmax.f32 %v2178_v36, %v4270_v39  ;;  %3216 = vmatpush1.bf16.msra.mxu0 %v3215_v18  ;;  %v3517_v9 = vld [vmem:[%s4987_s0 + $0xe0] sm:$0xff]  ;;  %v3518_v18 = vld [vmem:[%s4987_s0 + $0xe8] sm:$0xff] }
 0x3fd   :  { %5025 = vst [vmem:[#allocation16_spill] sm:$0xff] %v4419_v47  ;;  %v3271_v33 = vpack.c.bf16 %v4424_v49, %v4414_v6  ;;  %v3269_v22 = vpack.c.bf16 %v4429_v56, %v4419_v47 }
 0x3fe   :  { %v2181_v2 = vmax.f32 %v2179_v37, %v4308_v57  ;;  %v824_v43 = vmax.f32 %v822_v38, %v4387_v54  ;;  %v683_v40 = vpop.permute.xlu1 %682  ;;  %v688_v46 = vpop.permute.xlu0 %687  ;;  %v3519_v38 = vld [vmem:[%s4987_s0 + $0xf0] sm:$0xff]  ;;  %v825_v57 = vmax.f32 %v823_v3, %v4397_v32  ;;  %v3295_v3 = vld [vmem:[%s4990_s4 + $0x4] ss:$8 sps:$4 sm:$0xff]  }
 0x3ff   :  { %v4445_v36 = vmul.f32 %v3517_v9, %v683_v40  ;;  %v4450_v41 = vmul.f32 %v3518_v18, %v683_v40  ;;  %v4455_v51 = vmul.f32 %v3519_v38, %v688_v46  ;;  %v4460_v37 = vmul.f32 %v3520_v21, %v688_v46  ;;  %3270 = vmatprep.subr.bf16.mxu1 %v3269_v22  ;;  %v3523_v21 = vld [vmem:[%s4987_s0 + $0x1f0] sm:$0xff] }
 0x400   :  { %v2182_v9 = vmax.f32 %v2180_v63, %v4318_v4  ;;  %v2183_v40 = vmax.f32 %v2181_v2, %v4356_v59  ;;  %3272 = vmatpush1.bf16.msra.mxu1 %v3271_v33 }
 0x401   :  { %v826_v18 = vmax.f32 %v824_v43, %v4450_v41  ;;  %v3219_v39 = vpack.c.bf16 %v4455_v51, %v4445_v36  ;;  %v827_v34 = vmax.f32 %v825_v57, %v4460_v37  ;;  %v3217_v63 = vpack.c.bf16 %v4460_v37, %v4450_v41  ;;  %v3521_v43 = vld [vmem:[%s4987_s0 + $0x1e0] sm:$0xff]  ;;  %v3522_v57 = vld [vmem:[%s4987_s0 + $0x1e8] sm:$0xff] }
 0x402   :  { %v2184_v38 = vmax.f32 %v2182_v9, %v4366_v29  ;;  %v2044_v54 = vpop.permute.xlu1 %2043  ;;  %v2049_v46 = vpop.permute.xlu0 %2048  ;;  %v2185_v2 = vmax.f32 %v2183_v40, %v4419_v47 }
 0x403   :  { %v4479_v33 = vmul.f32 %v3521_v43, %v2044_v54  ;;  %v4484_v22 = vmul.f32 %v3522_v57, %v2044_v54  ;;  %v4489_v9 = vmul.f32 %v3523_v21, %v2049_v46  ;;  %v828_v47 = vmax.f32 %v826_v18, %v827_v34  ;;  %v3524_v43 = vld [vmem:[%s4987_s0 + $0x1f8] sm:$0xff]  ;;  %3218 = vmatprep.subr.bf16.mxu0 %v3217_v63  ;;  %v3293_v57 = vld [vmem:[%s4990_s4] ss:$8 sps:$4 sm:$0xff]  }
 0x404   :  { %v2186_v40 = vmax.f32 %v2184_v38, %v4429_v56  ;;  %v4495_v29 = vmul.f32 %v3524_v43, %v2049_v46  ;;  %3220 = vmatpush1.bf16.msra.mxu0 %v3219_v39  ;;  %v3298_v38 = vld [vmem:[%s4990_s4 + $0x14] ss:$8 sps:$4 sm:$0xff]   ;;  %v3530_v63 = vmov 1.0   ;;  %v3301_v43 = vld [vmem:[%s4990_s4 + $0x24] ss:$8 sps:$4 sm:$0xff]  }
 0x405   :  { %5026 = vst [vmem:[#allocation17_spill] sm:$0xff] %v4484_v22  ;;  %v2187_v59 = vmax.f32 %v2185_v2, %v4484_v22  ;;  %v3275_v54 = vpack.c.bf16 %v4489_v9, %v4479_v33  ;;  %v829_v21 = vrot.slane %v828_v47, 4  ;;  %1063 = vmatprep.subr.bf16.mxu0 %v3295_v3  ;;  %v3296_v2 = vld [vmem:[%s4990_s4 + $0x10] ss:$8 sps:$4 sm:$0xff]  }
 0x406   :  { %5027 = vst [vmem:[#allocation18_spill] sm:$0xff] %v4495_v29  ;;  %v2188_v34 = vmax.f32 %v2186_v40, %v4495_v29  ;;  %v3273_v18 = vpack.c.bf16 %v4495_v29, %v4484_v22 }
 0x407   :  { %787 = vmatmul.mubr.f32.vlgmr.msra.gmra.mrb[18].mxu0 %v3530_v63  ;;  %v830_v39 = vmax.f32 %v828_v47, %v829_v21  ;;  %v3299_v47 = vld [vmem:[%s4990_s4 + $0x20] ss:$8 sps:$4 sm:$0xff]  }
 0x408   :  { %v2189_v46 = vmax.f32 %v2187_v59, %v2188_v34  ;;  %3274 = vmatprep.subr.bf16.mxu1 %v3273_v18  ;;  %1064 = vmatpush1.bf16.msra.mxu0 %v3293_v57 }
 0x409   :  { %3276 = vmatpush1.bf16.msra.mxu1 %v3275_v54  ;;  %1065 = vmatprep.subr.bf16.mxu0 %v3298_v38  ;;  %v831_v29 = vrot.slane %v830_v39, 2 }
 0x40a   :  { %v2190_v40 = vrot.slane %v2189_v46, 4  ;;  %2424 = vmatprep.subr.bf16.mxu1 %v3295_v3  ;;  %v3304_v3 = vld [vmem:[%s4990_s4 + $0x34] ss:$8 sps:$4 sm:$0xff]  }
 0x40b   :  { %v832_v59 = vmax.f32 %v830_v39, %v831_v29  ;;  %v3302_v29 = vld [vmem:[%s4990_s4 + $0x30] ss:$8 sps:$4 sm:$0xff]   ;;  %v3305_v39 = vld [vmem:[%s4990_s4 + $0x40] ss:$8 sps:$4 sm:$0xff]  }
 0x40c   :  { %2148 = vmatmul.mubr.f32.vlgmr.msra.gmra.mrb[18].mxu1 %v3530_v63  ;;  %v2191_v34 = vmax.f32 %v2189_v46, %v2190_v40  ;;  %1066 = vmatpush1.bf16.msra.mxu0 %v3296_v2  ;;  %v3310_v40 = vld [vmem:[%s4990_s4 + $0x54] ss:$8 sps:$4 sm:$0xff]  }
 0x40d   :  { %2425 = vmatpush1.bf16.msra.mxu1 %v3293_v57  ;;  %1067 = vmatprep.subr.bf16.mxu0 %v3301_v43  ;;  %v833_v54 = vrot.slane %v832_v59, 1 }
 0x40e   :  { %2426 = vmatprep.subr.bf16.mxu1 %v3298_v38  ;;  %v2192_v21 = vrot.slane %v2191_v34, 2  ;;  %v3307_v38 = vld [vmem:[%s4990_s4 + $0x44] ss:$8 sps:$4 sm:$0xff]  }
 0x40f   :  { %v834_v18 = vmax.f32 %v832_v59, %v833_v54  ;;  %v794_v59 = vmax.f32 %v4087_v52, %v4145_v30  ;;  %v2154_v54 = vmax.f32 %v4107_v60, %v4159_v0 }
 0x410   :  { %v2193_v22 = vmax.f32 %v2191_v34, %v2192_v21  ;;  %1068 = vmatpush1.bf16.msra.mxu0 %v3299_v47  ;;  %v3313_v34 = vld [vmem:[%s4990_s4 + $0x64] ss:$8 sps:$4 sm:$0xff]   ;;  %v3311_v21 = vld [vmem:[%s4990_s4 + $0x60] ss:$8 sps:$4 sm:$0xff]  }
 0x411   :  { %2427 = vmatpush1.bf16.msra.mxu1 %v3296_v2  ;;  %1069 = vmatprep.subr.bf16.mxu0 %v3304_v3  ;;  %v870_v57 = vpack.c.bf16 %v834_v18, %v834_v18  ;;  %v2155_v18 = vmax.f32 %v4097_v7, %v4169_v8 }
 0x412   :  { %2428 = vmatprep.subr.bf16.mxu1 %v3301_v43  ;;  %v2194_v46 = vrot.slane %v2193_v22, 1  ;;  %v793_v43 = vmax.f32 %v4117_v13, %v4135_v28 }
 0x413   :  { %1095 = vmatprep.mubr.bf16.mxu0 %v870_v57 }
 0x414   :  { %v2195_v63 = vmax.f32 %v2193_v22, %v2194_v46  ;;  %1070 = vmatpush1.bf16.msra.mxu0 %v3302_v29  ;;  %v3308_v22 = vld [vmem:[%s4990_s4 + $0x50] ss:$8 sps:$4 sm:$0xff]   ;;  %v2156_v46 = vmax.f32 %v2154_v54, %v4207_v62  ;;  %v3319_v54 = vld [vmem:[%s4990_s4 + $0x84] ss:$8 sps:$4 sm:$0xff]  }
 0x415   :  { %2429 = vmatpush1.bf16.msra.mxu1 %v3299_v47  ;;  %1071 = vmatprep.subr.bf16.mxu0 %v3307_v38  ;;  %v795_v47 = vmax.f32 %v793_v43, %v4183_v20 }
 0x416   :  { %2430 = vmatprep.subr.bf16.mxu1 %v3304_v3  ;;  %v2231_v2 = vpack.c.bf16 %v2195_v63, %v2195_v63  ;;  %v796_v3 = vmax.f32 %v794_v59, %v4193_v44  ;;  %v2157_v63 = vmax.f32 %v2155_v18, %v4217_v55  ;;  %v2158_v43 = vmax.f32 %v2156_v46, %v4255_v11 }
 0x418   :  { %2456 = vmatprep.mubr.bf16.mxu1 %v2231_v2  ;;  %1072 = vmatpush1.bf16.msra.mxu0 %v3305_v39  ;;  %v798_v57 = vmax.f32 %v796_v3, %v4241_v26  ;;  %v2159_v59 = vmax.f32 %v2157_v63, %v4265_v17  ;;  %v2160_v18 = vmax.f32 %v2158_v43, %v4303_v1  ;;  %v3322_v43 = vld [vmem:[%s4990_s4 + $0x94] ss:$8 sps:$4 sm:$0xff]  }
 0x419   :  { %2431 = vmatpush1.bf16.msra.mxu1 %v3302_v29  ;;  %1073 = vmatprep.subr.bf16.mxu0 %v3310_v40  ;;  %v797_v29 = vmax.f32 %v795_v47, %v4231_v25 }
 0x41a   :  { %2432 = vmatprep.subr.bf16.mxu1 %v3307_v38  ;;  %v3316_v38 = vld [vmem:[%s4990_s4 + $0x74] ss:$8 sps:$4 sm:$0xff]   ;;  %v800_v2 = vmax.f32 %v798_v57, %v4289_v48  ;;  %v2162_v46 = vmax.f32 %v2160_v18, %v4351_v53 }
 0x41c   :  { %1074 = vmatpush1.bf16.msra.mxu0 %v3308_v22  ;;  %v802_v3 = vmax.f32 %v800_v2, %v4337_v14 }
 0x41d   :  { %2433 = vmatpush1.bf16.msra.mxu1 %v3305_v39  ;;  %1075 = vmatprep.subr.bf16.mxu0 %v3313_v34  ;;  %v799_v39 = vmax.f32 %v797_v29, %v4279_v5 }
 0x41e   :  { %2434 = vmatprep.subr.bf16.mxu1 %v3310_v40  ;;  %v3314_v40 = vld [vmem:[%s4990_s4 + $0x70] ss:$8 sps:$4 sm:$0xff]   ;;  %v804_v57 = vmax.f32 %v802_v3, %v4392_v23 }
 0x41f   :  { %v801_v47 = vmax.f32 %v799_v39, %v4327_v35 }
 0x420   :  { %1076 = vmatpush1.bf16.msra.mxu0 %v3311_v21  ;;  %v806_v2 = vmax.f32 %v804_v57, %v4455_v51 }
 0x421   :  { %2435 = vmatpush1.bf16.msra.mxu1 %v3308_v22  ;;  %1077 = vmatprep.subr.bf16.mxu0 %v3316_v38  ;;  %v2161_v22 = vmax.f32 %v2159_v59, %v4313_v19  ;;  %v803_v29 = vmax.f32 %v801_v47, %v4382_v50  ;;  %v2164_v59 = vmax.f32 %v2162_v46, %v4414_v6  ;;  %v3320_v47 = vld [vmem:[%s4990_s4 + $0x90] ss:$8 sps:$4 sm:$0xff]   ;;  %v3328_v46 = vld [vmem:[%s4990_s4 + $0xb4] ss:$8 sps:$4 sm:$0xff]  }
 0x422   :  { %2436 = vmatprep.subr.bf16.mxu1 %v3313_v34  ;;  %v3317_v34 = vld [vmem:[%s4990_s4 + $0x80] ss:$8 sps:$4 sm:$0xff]  }
 0x423   :  { %v2163_v63 = vmax.f32 %v2161_v22, %v4361_v10  ;;  %v805_v39 = vmax.f32 %v803_v29, %v4445_v36  ;;  %v2166_v18 = vmax.f32 %v2164_v59, %v4479_v33  ;;  %v3334_v59 = vld [vmem:[%s4990_s4 + $0xd4] ss:$8 sps:$4 sm:$0xff]  }
 0x424   :  { %1078 = vmatpush1.bf16.msra.mxu0 %v3314_v40 }
 0x425   :  { %2437 = vmatpush1.bf16.msra.mxu1 %v3311_v21  ;;  %1079 = vmatprep.subr.bf16.mxu0 %v3319_v54  ;;  %v2165_v21 = vmax.f32 %v2163_v63, %v4424_v49  ;;  %v807_v3 = vmax.f32 %v805_v39, %v806_v2  ;;  %v3331_v39 = vld [vmem:[%s4990_s4 + $0xc4] ss:$8 sps:$4 sm:$0xff]   ;;  %v3329_v2 = vld [vmem:[%s4990_s4 + $0xc0] ss:$8 sps:$4 sm:$0xff]  }
 0x426   :  { %2438 = vmatprep.subr.bf16.mxu1 %v3316_v38  ;;  %v3325_v38 = vld [vmem:[%s4990_s4 + $0xa4] ss:$8 sps:$4 sm:$0xff]  }
 0x427   :  { %v2167_v22 = vmax.f32 %v2165_v21, %v4489_v9  ;;  %v808_v29 = vrot.slane %v807_v3, 4 }
 0x428   :  { %1080 = vmatpush1.bf16.msra.mxu0 %v3317_v34 }
 0x429   :  { %2439 = vmatpush1.bf16.msra.mxu1 %v3314_v40  ;;  %1081 = vmatprep.subr.bf16.mxu0 %v3322_v43  ;;  %v3323_v40 = vld [vmem:[%s4990_s4 + $0xa0] ss:$8 sps:$4 sm:$0xff]   ;;  %v2168_v57 = vmax.f32 %v2166_v18, %v2167_v22  ;;  %v809_v63 = vmax.f32 %v807_v3, %v808_v29  ;;  %v3337_v18 = vld [vmem:[%s4990_s4 + $0xe4] ss:$8 sps:$4 sm:$0xff]  }
 0x42a   :  { %2440 = vmatprep.subr.bf16.mxu1 %v3319_v54  ;;  %v3326_v54 = vld [vmem:[%s4990_s4 + $0xb0] ss:$8 sps:$4 sm:$0xff]  }
 0x42b   :  { %v810_v21 = vrot.slane %v809_v63, 2 }
 0x42c   :  { %1082 = vmatpush1.bf16.msra.mxu0 %v3320_v47 }
 0x42d   :  { %2441 = vmatpush1.bf16.msra.mxu1 %v3317_v34  ;;  %1083 = vmatprep.subr.bf16.mxu0 %v3325_v38  ;;  %v2169_v34 = vrot.slane %v2168_v57, 4  ;;  %v811_v22 = vmax.f32 %v809_v63, %v810_v21  ;;  %v3344_v21 = vld [vmem:[%s4991_s3 + $0x10] ss:$8 sps:$4 sm:$0xff]  }
 0x42e   :  { %2442 = vmatprep.subr.bf16.mxu1 %v3322_v43 }
 0x42f   :  { %v2170_v43 = vmax.f32 %v2168_v57, %v2169_v34  ;;  %v812_v29 = vrot.slane %v811_v22, 1  ;;  %v3343_v34 = vld [vmem:[%s4991_s3 + $0x4] ss:$8 sps:$4 sm:$0xff]  }
 0x430   :  { %1084 = vmatpush1.bf16.msra.mxu0 %v3323_v40 }
 0x431   :  { %2443 = vmatpush1.bf16.msra.mxu1 %v3320_v47  ;;  %1085 = vmatprep.subr.bf16.mxu0 %v3328_v46  ;;  %v3332_v47 = vld [vmem:[%s4990_s4 + $0xd0] ss:$8 sps:$4 sm:$0xff]   ;;  %v2171_v3 = vrot.slane %v2170_v43, 2 }
 0x432   :  { %2444 = vmatprep.subr.bf16.mxu1 %v3325_v38  ;;  %v3335_v38 = vld [vmem:[%s4990_s4 + $0xe0] ss:$8 sps:$4 sm:$0xff]  }
 0x433   :  { %v2172_v57 = vmax.f32 %v2170_v43, %v2171_v3  ;;  %v3349_v3 = vld [vmem:[%s4991_s3 + $0x24] ss:$8 sps:$4 sm:$0xff]  }
 0x434   :  { %1086 = vmatpush1.bf16.msra.mxu0 %v3326_v54 }
 0x435   :  { %2445 = vmatpush1.bf16.msra.mxu1 %v3323_v40  ;;  %1087 = vmatprep.subr.bf16.mxu0 %v3331_v39  ;;  %v3340_v40 = vld [vmem:[%s4990_s4 + $0xf4] ss:$8 sps:$4 sm:$0xff]   ;;  %v2173_v63 = vrot.slane %v2172_v57, 1 }
 0x436   :  { %2446 = vmatprep.subr.bf16.mxu1 %v3328_v46  ;;  %v3338_v46 = vld [vmem:[%s4990_s4 + $0xf0] ss:$8 sps:$4 sm:$0xff]  }
 0x437   :  { %v2174_v43 = vmax.f32 %v2172_v57, %v2173_v63  ;;  %v3358_v57 = vld [vmem:[%s4991_s3 + $0x54] ss:$8 sps:$4 sm:$0xff]   ;;  %v3359_v63 = vld [vmem:[%s4991_s3 + $0x60] ss:$8 sps:$4 sm:$0xff]  }
 0x438   :  { %1088 = vmatpush1.bf16.msra.mxu0 %v3329_v2 }
 0x439   :  { %2447 = vmatpush1.bf16.msra.mxu1 %v3326_v54  ;;  %1089 = vmatprep.subr.bf16.mxu0 %v3334_v59  ;;  %v813_v54 = vmax.f32 %v811_v22, %v812_v29  ;;  %v3352_v22 = vld [vmem:[%s4991_s3 + $0x34] ss:$8 sps:$4 sm:$0xff]   ;;  %v3353_v29 = vld [vmem:[%s4991_s3 + $0x40] ss:$8 sps:$4 sm:$0xff]  }
 0x43a   :  { %2448 = vmatprep.subr.bf16.mxu1 %v3331_v39  ;;  %v3341_v39 = vld [vmem:[%s4991_s3] ss:$8 sps:$4 sm:$0xff]  }
 0x43c   :  { %1090 = vmatpush1.bf16.msra.mxu0 %v3332_v47 }
 0x43d   :  { %2449 = vmatpush1.bf16.msra.mxu1 %v3329_v2  ;;  %1091 = vmatprep.subr.bf16.mxu0 %v3337_v18  ;;  %v869_v2 = vpack.c.bf16 %v813_v54, %v813_v54  ;;  %v3361_v54 = vld [vmem:[%s4991_s3 + $0x64] ss:$8 sps:$4 sm:$0xff]  }
 0x43e   :  { %2450 = vmatprep.subr.bf16.mxu1 %v3334_v59  ;;  %v3346_v59 = vld [vmem:[%s4991_s3 + $0x14] ss:$8 sps:$4 sm:$0xff]  }
 0x440   :  { %1092 = vmatpush1.bf16.msra.mxu0 %v3335_v38 }
 0x441   :  { %2451 = vmatpush1.bf16.msra.mxu1 %v3332_v47  ;;  %1093 = vmatprep.subr.bf16.mxu0 %v3340_v40  ;;  %v2230_v47 = vpack.c.bf16 %v2174_v43, %v2174_v43  ;;  %v3365_v43 = vld [vmem:[%s4991_s3 + $0x80] ss:$8 sps:$4 sm:$0xff]  }
 0x442   :  { %2452 = vmatprep.subr.bf16.mxu1 %v3337_v18  ;;  %v3347_v18 = vld [vmem:[%s4991_s3 + $0x20] ss:$8 sps:$4 sm:$0xff]  }
 0x444   :  { %1094 = vmatpush1.bf16.msra.mxu0 %v3338_v46 }
 0x445   :  { %2453 = vmatpush1.bf16.msra.mxu1 %v3335_v38  ;;  %1264 = vmatprep.subr.bf16.mxu0 %v3343_v34  ;;  %v3350_v38 = vld [vmem:[%s4991_s3 + $0x30] ss:$8 sps:$4 sm:$0xff]  }
 0x446   :  { %2454 = vmatprep.subr.bf16.mxu1 %v3340_v40  ;;  %v3355_v40 = vld [vmem:[%s4991_s3 + $0x44] ss:$8 sps:$4 sm:$0xff]  }
 0x447   :  { %1096 = vmatmul.mubr.bf16.vlgmr.msra.gmra.mrb[20].mxu0 %v869_v2  ;;  %v3367_v2 = vld [vmem:[%s4991_s3 + $0x84] ss:$8 sps:$4 sm:$0xff]  }
 0x448   :  { %1265 = vmatpush1.bf16.msra.mxu0 %v3341_v39 }
 0x449   :  { %2455 = vmatpush1.bf16.msra.mxu1 %v3338_v46  ;;  %1266 = vmatprep.subr.bf16.mxu0 %v3346_v59  ;;  %v3356_v46 = vld [vmem:[%s4991_s3 + $0x50] ss:$8 sps:$4 sm:$0xff]  }
 0x44a   :  { %2625 = vmatprep.subr.bf16.mxu1 %v3343_v34  ;;  %v3364_v34 = vld [vmem:[%s4991_s3 + $0x74] ss:$8 sps:$4 sm:$0xff]  }
 0x44c   :  { %2457 = vmatmul.mubr.bf16.vlgmr.msra.gmra.mrb[20].mxu1 %v2230_v47  ;;  %1267 = vmatpush1.bf16.msra.mxu0 %v3344_v21  ;;  %v3373_v47 = vld [vmem:[%s4991_s3 + $0xa4] ss:$8 sps:$4 sm:$0xff]  }
 0x44d   :  { %2626 = vmatpush1.bf16.msra.mxu1 %v3341_v39  ;;  %1268 = vmatprep.subr.bf16.mxu0 %v3349_v3  ;;  %v3362_v39 = vld [vmem:[%s4991_s3 + $0x70] ss:$8 sps:$4 sm:$0xff]  }
 0x44e   :  { %2627 = vmatprep.subr.bf16.mxu1 %v3346_v59  ;;  %v3370_v59 = vld [vmem:[%s4991_s3 + $0x94] ss:$8 sps:$4 sm:$0xff]  }
 0x450   :  { %1269 = vmatpush1.bf16.msra.mxu0 %v3347_v18 }
 0x451   :  { %2628 = vmatpush1.bf16.msra.mxu1 %v3344_v21  ;;  %1270 = vmatprep.subr.bf16.mxu0 %v3352_v22  ;;  %v3368_v21 = vld [vmem:[%s4991_s3 + $0x90] ss:$8 sps:$4 sm:$0xff]  }
 0x452   :  { %2629 = vmatprep.subr.bf16.mxu1 %v3349_v3  ;;  %v3371_v3 = vld [vmem:[%s4991_s3 + $0xa0] ss:$8 sps:$4 sm:$0xff]  }
 0x454   :  { %1271 = vmatpush1.bf16.msra.mxu0 %v3350_v38 }
 0x455   :  { %2630 = vmatpush1.bf16.msra.mxu1 %v3347_v18  ;;  %1272 = vmatprep.subr.bf16.mxu0 %v3355_v40  ;;  %v3376_v18 = vld [vmem:[%s4991_s3 + $0xb4] ss:$8 sps:$4 sm:$0xff]  }
 0x456   :  { %2631 = vmatprep.subr.bf16.mxu1 %v3352_v22  ;;  %v3374_v22 = vld [vmem:[%s4991_s3 + $0xb0] ss:$8 sps:$4 sm:$0xff]  }
 0x458   :  { %1273 = vmatpush1.bf16.msra.mxu0 %v3353_v29 }
 0x459   :  { %2632 = vmatpush1.bf16.msra.mxu1 %v3350_v38  ;;  %1274 = vmatprep.subr.bf16.mxu0 %v3358_v57  ;;  %v3379_v38 = vld [vmem:[%s4991_s3 + $0xc4] ss:$8 sps:$4 sm:$0xff]  }
 0x45a   :  { %2633 = vmatprep.subr.bf16.mxu1 %v3355_v40  ;;  %v3377_v40 = vld [vmem:[%s4991_s3 + $0xc0] ss:$8 sps:$4 sm:$0xff]  }
 0x45c   :  { %1275 = vmatpush1.bf16.msra.mxu0 %v3356_v46 }
 0x45d   :  { %2634 = vmatpush1.bf16.msra.mxu1 %v3353_v29  ;;  %1276 = vmatprep.subr.bf16.mxu0 %v3361_v54  ;;  %v3382_v29 = vld [vmem:[%s4991_s3 + $0xd4] ss:$8 sps:$4 sm:$0xff]  }
 0x45e   :  { %2635 = vmatprep.subr.bf16.mxu1 %v3358_v57  ;;  %v3380_v57 = vld [vmem:[%s4991_s3 + $0xd0] ss:$8 sps:$4 sm:$0xff]  }
 0x460   :  { %1277 = vmatpush1.bf16.msra.mxu0 %v3359_v63 }
 0x461   :  { %2636 = vmatpush1.bf16.msra.mxu1 %v3356_v46  ;;  %1278 = vmatprep.subr.bf16.mxu0 %v3364_v34  ;;  %v3385_v46 = vld [vmem:[%s4991_s3 + $0xe4] ss:$8 sps:$4 sm:$0xff]  }
 0x462   :  { %2637 = vmatprep.subr.bf16.mxu1 %v3361_v54  ;;  %v3383_v54 = vld [vmem:[%s4991_s3 + $0xe0] ss:$8 sps:$4 sm:$0xff]  }
 0x464   :  { %1279 = vmatpush1.bf16.msra.mxu0 %v3362_v39 }
 0x465   :  { %2638 = vmatpush1.bf16.msra.mxu1 %v3359_v63  ;;  %1280 = vmatprep.subr.bf16.mxu0 %v3367_v2  ;;  %v3388_v63 = vld [vmem:[%s4991_s3 + $0xf4] ss:$8 sps:$4 sm:$0xff]  }
 0x466   :  { %2639 = vmatprep.subr.bf16.mxu1 %v3364_v34  ;;  %v3386_v34 = vld [vmem:[%s4991_s3 + $0xf0] ss:$8 sps:$4 sm:$0xff]  }
 0x468   :  { %1281 = vmatpush1.bf16.msra.mxu0 %v3365_v43 }
 0x469   :  { %2640 = vmatpush1.bf16.msra.mxu1 %v3362_v39  ;;  %1282 = vmatprep.subr.bf16.mxu0 %v3370_v59 }
 0x46a   :  { %2641 = vmatprep.subr.bf16.mxu1 %v3367_v2 }
 0x46c   :  { %1283 = vmatpush1.bf16.msra.mxu0 %v3368_v21 }
 0x46d   :  { %2642 = vmatpush1.bf16.msra.mxu1 %v3365_v43  ;;  %1284 = vmatprep.subr.bf16.mxu0 %v3373_v47 }
 0x46e   :  { %2643 = vmatprep.subr.bf16.mxu1 %v3370_v59 }
 0x470   :  { %1285 = vmatpush1.bf16.msra.mxu0 %v3371_v3 }
 0x471   :  { %2644 = vmatpush1.bf16.msra.mxu1 %v3368_v21  ;;  %1286 = vmatprep.subr.bf16.mxu0 %v3376_v18 }
 0x472   :  { %2645 = vmatprep.subr.bf16.mxu1 %v3373_v47 }
 0x474   :  { %1287 = vmatpush1.bf16.msra.mxu0 %v3374_v22 }
 0x475   :  { %2646 = vmatpush1.bf16.msra.mxu1 %v3371_v3  ;;  %1288 = vmatprep.subr.bf16.mxu0 %v3379_v38 }
 0x476   :  { %2647 = vmatprep.subr.bf16.mxu1 %v3376_v18 }
 0x478   :  { %1289 = vmatpush1.bf16.msra.mxu0 %v3377_v40 }
 0x479   :  { %2648 = vmatpush1.bf16.msra.mxu1 %v3374_v22  ;;  %1290 = vmatprep.subr.bf16.mxu0 %v3382_v29 }
 0x47a   :  { %2649 = vmatprep.subr.bf16.mxu1 %v3379_v38 }
 0x47c   :  { %1291 = vmatpush1.bf16.msra.mxu0 %v3380_v57 }
 0x47d   :  { %2650 = vmatpush1.bf16.msra.mxu1 %v3377_v40  ;;  %1292 = vmatprep.subr.bf16.mxu0 %v3385_v46 }
 0x47e   :  { %2651 = vmatprep.subr.bf16.mxu1 %v3382_v29 }
 0x480   :  { %1293 = vmatpush1.bf16.msra.mxu0 %v3383_v54 }
 0x481   :  { %2652 = vmatpush1.bf16.msra.mxu1 %v3380_v57  ;;  %1294 = vmatprep.subr.bf16.mxu0 %v3388_v63 }
 0x482   :  { %2653 = vmatprep.subr.bf16.mxu1 %v3385_v46 }
 0x484   :  { %1295 = vmatpush1.bf16.msra.mxu0 %v3386_v34 }
 0x485   :  { %2654 = vmatpush1.bf16.msra.mxu1 %v3383_v54 }
 0x486   :  { %2655 = vmatprep.subr.bf16.mxu1 %v3388_v63 }
 0x489   :  { %2656 = vmatpush1.bf16.msra.mxu1 %v3386_v34 }
 0x4da   :  { %v788_v39 = vpop.f32.mrb[18].mxu0 }
 0x4db   :  { %v835_v2 = vpack.c.bf16 %v788_v39, %v788_v39  ;;  %v790_v43 = vpop.f32.mrb[19].mxu0 }
 0x4dc   :  { %v836_v59 = vpack.c.bf16 %v790_v43, %v790_v43 }
 0x4de   :  { %1296 = vmatprep.mubr.bf16.mxu0 %v836_v59  ;;  %v5028_v59 = vlaneseq }
 0x4df   :  { %v2149_v21 = vpop.f32.mrb[18].mxu1  ;;  %1297 = vmatmul.mubr.bf16.vlgmr.msra.gmra.mrb[20].mxu0 %v835_v2 }
 0x4e0   :  { %v2151_v47 = vpop.f32.mrb[19].mxu1  ;;  %v2196_v18 = vpack.c.bf16 %v2149_v21, %v2149_v21  ;;  %v1314_v21 = vshrl.u32 %v5028_v59, 7 }
 0x4e1   :  { %v2197_v3 = vpack.c.bf16 %v2151_v47, %v2151_v47 }
 0x4e3   :  { %2657 = vmatprep.mubr.bf16.mxu1 %v2197_v3 }
 0x4e4   :  { %2658 = vmatmul.mubr.bf16.vlgmr.msra.gmra.mrb[20].mxu1 %v2196_v18 }
 0x5b2   :  { %v1298_v22 = vpop.f32.mrb[20].mxu0 }
 0x5b3   :  { %v1305_v38 = vmul.f32 0.5, %v1298_v22  ;;  %v1300_v40 = vpop.f32.mrb[21].mxu0  ;;  %v4725_v22 = vsub.s32 0, %v1314_v21 }
 0x5b4   :  { %v1306_v29 = vmul.f32 0.5, %v1300_v40  ;;  %v1302_v57 = vpop.f32.mrb[22].mxu0 }
 0x5b5   :  { %3453 = vtanh.f32 %v1305_v38  ;;  %v1303_v46 = vpop.f32.mrb[23].mxu0 }
 0x5b6   :  { %3455 = vtanh.f32 %v1306_v29 }
 0x5b7   :  { %v2659_v54 = vpop.f32.mrb[20].mxu1 }
 0x5b8   :  { %v2666_v63 = vmul.f32 0.5, %v2659_v54  ;;  %v2661_v34 = vpop.f32.mrb[21].mxu1 }
 0x5b9   :  { %v2667_v39 = vmul.f32 0.5, %v2661_v34  ;;  %v2663_v43 = vpop.f32.mrb[22].mxu1 }
 0x5ba   :  { %3457 = vtanh.f32 %v2666_v63  ;;  %v2664_v2 = vpop.f32.mrb[23].mxu1 }
 0x5bb   :  { %3459 = vtanh.f32 %v2667_v39 }
 0x5bf   :  { %v3454_v47 = vpop.eup %3453 }
 0x5c0   :  { %v3456_v3 = vpop.eup %3455  ;;  %v1309_v18 = vmul.f32 0.5, %v3454_v47 }
 0x5c1   :  { %v1310_v40 = vmul.f32 0.5, %v3456_v3 }
 0x5c2   :  { %v1311_v57 = vadd.f32 0.5, %v1309_v18 }
 0x5c3   :  { %v1312_v46 = vadd.f32 0.5, %v1310_v40 }
 0x5c4   :  { %v3458_v38 = vpop.eup %3457  ;;  %v1316_v54 = vrot.slane %v1311_v57, %v4725_v22 }
 0x5c5   :  { %v3460_v29 = vpop.eup %3459  ;;  %v1320_v34 = vrot.slane %v1312_v46, %v4725_v22  ;;  %v2670_v43 = vmul.f32 0.5, %v3458_v38 }
 0x5c6   :  { %v2671_v63 = vmul.f32 0.5, %v3460_v29  ;;  %v1321_v39 = vmul.f32 %v1316_v54, %v4117_v13  ;;  %v1323_v2 = vmul.f32 %v1316_v54, %v4087_v52  ;;  %v1325_v59 = vmul.f32 %v1316_v54, %v4135_v28 }
 0x5c7   :  { %v1327_v21 = vmul.f32 %v1316_v54, %v4145_v30  ;;  %v1329_v47 = vmul.f32 %v1316_v54, %v4183_v20  ;;  %v1331_v3 = vmul.f32 %v1316_v54, %v4193_v44  ;;  %v1333_v18 = vmul.f32 %v1316_v54, %v4231_v25 }
 0x5c8   :  { %v1335_v40 = vmul.f32 %v1316_v54, %v4241_v26  ;;  %v1337_v57 = vmul.f32 %v1316_v54, %v4279_v5  ;;  %v1339_v38 = vmul.f32 %v1316_v54, %v4289_v48  ;;  %v1341_v13 = vmul.f32 %v1316_v54, %v4327_v35  ;;  %1353 = vst [vmem:[%s4992_s5] sm:$0xff] %v1321_v39 }
 0x5c9   :  { %v1343_v52 = vmul.f32 %v1316_v54, %v4337_v14  ;;  %1355 = vst [vmem:[%s4992_s5 + $0x10] sm:$0xff] %v1323_v2  ;;  %1357 = vst [vmem:[%s4992_s5 + $0x20] sm:$0xff] %v1325_v59  ;;  %v1345_v28 = vmul.f32 %v1316_v54, %v4382_v50  ;;  %v1347_v30 = vmul.f32 %v1316_v54, %v4392_v23  ;;  %v5030_v14 = vld [vmem:[#allocation11_spill] sm:$0xff] }
 0x5ca   :  { %1359 = vst [vmem:[%s4992_s5 + $0x30] sm:$0xff] %v1327_v21  ;;  %v1349_v20 = vmul.f32 %v1316_v54, %v4445_v36  ;;  %v1351_v44 = vmul.f32 %v1316_v54, %v4455_v51  ;;  %1361 = vst [vmem:[%s4992_s5 + $0x40] sm:$0xff] %v1329_v47  ;;  %v1322_v25 = vmul.f32 %v1320_v34, %v4122_v24  ;;  %v5037_v21 = vld [vmem:[#allocation8_spill] sm:$0xff] }
 0x5cb   :  { %1363 = vst [vmem:[%s4992_s5 + $0x50] sm:$0xff] %v1331_v3  ;;  %1365 = vst [vmem:[%s4992_s5 + $0x60] sm:$0xff] %v1333_v18  ;;  %v1324_v26 = vmul.f32 %v1320_v34, %v4092_v12  ;;  %v1326_v5 = vmul.f32 %v1320_v34, %v4140_v16  ;;  %v1328_v48 = vmul.f32 %v1320_v34, %v4150_v58  ;;  %v5029_v12 = vld [vmem:[#allocation6_spill] sm:$0xff]  ;;  %v5038_v3 = vld [vmem:[#allocation9_spill] sm:$0xff] }
 0x5cc   :  { %1367 = vst [vmem:[%s4992_s5 + $0x70] sm:$0xff] %v1335_v40  ;;  %1369 = vst [vmem:[%s4992_s5 + $0x80] sm:$0xff] %v1337_v57  ;;  %v1330_v24 = vmul.f32 %v1320_v34, %v5029_v12  ;;  %v1332_v16 = vmul.f32 %v1320_v34, %v4198_v45  ;;  %v1334_v58 = vmul.f32 %v1320_v34, %v4236_v31  ;;  %v5031_v45 = vld [vmem:[#allocation15_spill] sm:$0xff]  ;;  %v5039_v40 = vld [vmem:[#allocation10_spill] sm:$0xff] }
 0x5cd   :  { %1371 = vst [vmem:[%s4992_s5 + $0x90] sm:$0xff] %v1339_v38  ;;  %1373 = vst [vmem:[%s4992_s5 + $0xa0] sm:$0xff] %v1341_v13  ;;  %v1336_v35 = vmul.f32 %v1320_v34, %v4246_v27  ;;  %v1338_v50 = vmul.f32 %v1320_v34, %v5030_v14  ;;  %v1340_v23 = vmul.f32 %v1320_v34, %v4294_v15  ;;  %v5040_v38 = vld [vmem:[#allocation12_spill] sm:$0xff]  ;;  %v5045_v12 = vld [vmem:[#allocation18_spill] sm:$0xff] }
 0x5ce   :  { %1375 = vst [vmem:[%s4992_s5 + $0xb0] sm:$0xff] %v1343_v52  ;;  %1377 = vst [vmem:[%s4992_s5 + $0xc0] sm:$0xff] %v1345_v28  ;;  %v1342_v36 = vmul.f32 %v1320_v34, %v4332_v61  ;;  %v1344_v51 = vmul.f32 %v1320_v34, %v4342_v42  ;;  %v1346_v31 = vmul.f32 %v1320_v34, %v5031_v45  ;;  %v2672_v42 = vadd.f32 0.5, %v2670_v43  ;;  %v5041_v28 = vld [vmem:[#allocation13_spill] sm:$0xff] }
 0x5cf   :  { %1379 = vst [vmem:[%s4992_s5 + $0xd0] sm:$0xff] %v1347_v30  ;;  %1381 = vst [vmem:[%s4992_s5 + $0xe0] sm:$0xff] %v1349_v20  ;;  %v1348_v27 = vmul.f32 %v1320_v34, %v4397_v32  ;;  %v1350_v15 = vmul.f32 %v1320_v34, %v4450_v41  ;;  %v1352_v61 = vmul.f32 %v1320_v34, %v4460_v37  ;;  %v2673_v32 = vadd.f32 0.5, %v2671_v63  ;;  %v5042_v20 = vld [vmem:[#allocation14_spill] sm:$0xff] }
 0x5d0   :  { %1383 = vst [vmem:[%s4992_s5 + $0xf0] sm:$0xff] %v1351_v44  ;;  %1354 = vst [vmem:[%s4992_s5 + $0x8] sm:$0xff] %v1322_v25  ;;  %v2677_v41 = vrot.slane %v2672_v42, %v4725_v22 }
 0x5d1   :  { %1356 = vst [vmem:[%s4992_s5 + $0x18] sm:$0xff] %v1324_v26  ;;  %1358 = vst [vmem:[%s4992_s5 + $0x28] sm:$0xff] %v1326_v5  ;;  %v2681_v37 = vrot.slane %v2673_v32, %v4725_v22  ;;  %v5044_v5 = vld [vmem:[#allocation17_spill] sm:$0xff] }
 0x5d2   :  { %1360 = vst [vmem:[%s4992_s5 + $0x38] sm:$0xff] %v1328_v48  ;;  %1362 = vst [vmem:[%s4992_s5 + $0x48] sm:$0xff] %v1330_v24  ;;  %v2682_v46 = vmul.f32 %v2677_v41, %v4107_v60  ;;  %v2684_v29 = vmul.f32 %v2677_v41, %v4097_v7  ;;  %v2686_v54 = vmul.f32 %v2677_v41, %v4159_v0 }
 0x5d3   :  { %1364 = vst [vmem:[%s4992_s5 + $0x58] sm:$0xff] %v1332_v16  ;;  %1366 = vst [vmem:[%s4992_s5 + $0x68] sm:$0xff] %v1334_v58  ;;  %v2688_v34 = vmul.f32 %v2677_v41, %v4169_v8  ;;  %v2690_v43 = vmul.f32 %v2677_v41, %v4207_v62  ;;  %v2692_v63 = vmul.f32 %v2677_v41, %v4217_v55 }
 0x5d4   :  { %1368 = vst [vmem:[%s4992_s5 + $0x78] sm:$0xff] %v1336_v35  ;;  %1370 = vst [vmem:[%s4992_s5 + $0x88] sm:$0xff] %v1338_v50  ;;  %v2694_v39 = vmul.f32 %v2677_v41, %v4255_v11  ;;  %v2696_v2 = vmul.f32 %v2677_v41, %v4265_v17  ;;  %v2698_v59 = vmul.f32 %v2677_v41, %v4303_v1  ;;  %v5032_v11 = vld [vmem:[#allocation3_spill] sm:$0xff]  ;;  %v5033_v1 = vld [vmem:[#allocation2_spill] sm:$0xff] }
 0x5d5   :  { %1372 = vst [vmem:[%s4992_s5 + $0x98] sm:$0xff] %v1340_v23  ;;  %1374 = vst [vmem:[%s4992_s5 + $0xa8] sm:$0xff] %v1342_v36  ;;  %v2700_v22 = vmul.f32 %v2677_v41, %v4313_v19  ;;  %v2702_v60 = vmul.f32 %v2677_v41, %v4351_v53  ;;  %v2704_v7 = vmul.f32 %v2677_v41, %v4361_v10  ;;  %v5034_v53 = vld [vmem:[#allocation4_spill] sm:$0xff] }
 0x5d6   :  { %1376 = vst [vmem:[%s4992_s5 + $0xb8] sm:$0xff] %v1344_v51  ;;  %1378 = vst [vmem:[%s4992_s5 + $0xc8] sm:$0xff] %v1346_v31  ;;  %v2706_v0 = vmul.f32 %v2677_v41, %v4414_v6  ;;  %v2708_v8 = vmul.f32 %v2677_v41, %v4424_v49  ;;  %v2710_v62 = vmul.f32 %v2677_v41, %v4479_v33  ;;  %v5035_v6 = vld [vmem:[#allocation5_spill] sm:$0xff]  ;;  %v5036_v33 = vld [vmem:[#allocation7_spill] sm:$0xff] }
 0x5d7   :  { %1380 = vst [vmem:[%s4992_s5 + $0xd8] sm:$0xff] %v1348_v27  ;;  %1382 = vst [vmem:[%s4992_s5 + $0xe8] sm:$0xff] %v1350_v15  ;;  %v2712_v55 = vmul.f32 %v2677_v41, %v4489_v9  ;;  %v2683_v17 = vmul.f32 %v2681_v37, %v5032_v11  ;;  %v2685_v19 = vmul.f32 %v2681_v37, %v5033_v1 }
 0x5d8   :  { %1384 = vst [vmem:[%s4992_s5 + $0xf8] sm:$0xff] %v1352_v61  ;;  %2943 = vst [vmem:[%s4992_s5 + $0x100] sm:$0xff] %v2682_v46  ;;  %v2687_v10 = vmul.f32 %v2681_v37, %v5034_v53  ;;  %v2689_v49 = vmul.f32 %v2681_v37, %v5035_v6  ;;  %v2691_v9 = vmul.f32 %v2681_v37, %v5036_v33 }
 0x5d9   :  { %2945 = vst [vmem:[%s4992_s5 + $0x110] sm:$0xff] %v2684_v29  ;;  %2947 = vst [vmem:[%s4992_s5 + $0x120] sm:$0xff] %v2686_v54  ;;  %v2693_v47 = vmul.f32 %v2681_v37, %v5037_v21  ;;  %v2695_v18 = vmul.f32 %v2681_v37, %v5038_v3  ;;  %v2697_v57 = vmul.f32 %v2681_v37, %v5039_v40 }
 0x5da   :  { %2949 = vst [vmem:[%s4992_s5 + $0x130] sm:$0xff] %v2688_v34  ;;  %2951 = vst [vmem:[%s4992_s5 + $0x140] sm:$0xff] %v2690_v43  ;;  %v2699_v13 = vmul.f32 %v2681_v37, %v5040_v38  ;;  %v2701_v52 = vmul.f32 %v2681_v37, %v4318_v4  ;;  %v2703_v30 = vmul.f32 %v2681_v37, %v5041_v28  ;;  %v5043_v4 = vld [vmem:[#allocation16_spill] sm:$0xff] }
 0x5db   :  { %2953 = vst [vmem:[%s4992_s5 + $0x150] sm:$0xff] %v2692_v63  ;;  %2955 = vst [vmem:[%s4992_s5 + $0x160] sm:$0xff] %v2694_v39  ;;  %v2705_v44 = vmul.f32 %v2681_v37, %v5042_v20  ;;  %v2707_v25 = vmul.f32 %v2681_v37, %v5043_v4  ;;  %v2709_v26 = vmul.f32 %v2681_v37, %v4429_v56 }
 0x5dc   :  { %2957 = vst [vmem:[%s4992_s5 + $0x170] sm:$0xff] %v2696_v2  ;;  %2959 = vst [vmem:[%s4992_s5 + $0x180] sm:$0xff] %v2698_v59  ;;  %v2711_v48 = vmul.f32 %v2681_v37, %v5044_v5  ;;  %v2713_v24 = vmul.f32 %v2681_v37, %v5045_v12 }
 0x5dd   :  { %2961 = vst [vmem:[%s4992_s5 + $0x190] sm:$0xff] %v2700_v22  ;;  %2963 = vst [vmem:[%s4992_s5 + $0x1a0] sm:$0xff] %v2702_v60 }
 0x5de   :  { %2965 = vst [vmem:[%s4992_s5 + $0x1b0] sm:$0xff] %v2704_v7  ;;  %2967 = vst [vmem:[%s4992_s5 + $0x1c0] sm:$0xff] %v2706_v0 }
 0x5df   :  { %2969 = vst [vmem:[%s4992_s5 + $0x1d0] sm:$0xff] %v2708_v8  ;;  %2971 = vst [vmem:[%s4992_s5 + $0x1e0] sm:$0xff] %v2710_v62 }
 0x5e0   :  { %2973 = vst [vmem:[%s4992_s5 + $0x1f0] sm:$0xff] %v2712_v55  ;;  %2944 = vst [vmem:[%s4992_s5 + $0x108] sm:$0xff] %v2683_v17 }
 0x5e1   :  { %2946 = vst [vmem:[%s4992_s5 + $0x118] sm:$0xff] %v2685_v19  ;;  %2948 = vst [vmem:[%s4992_s5 + $0x128] sm:$0xff] %v2687_v10 }
 0x5e2   :  { %2950 = vst [vmem:[%s4992_s5 + $0x138] sm:$0xff] %v2689_v49  ;;  %2952 = vst [vmem:[%s4992_s5 + $0x148] sm:$0xff] %v2691_v9 }
 0x5e3   :  { %2954 = vst [vmem:[%s4992_s5 + $0x158] sm:$0xff] %v2693_v47  ;;  %2956 = vst [vmem:[%s4992_s5 + $0x168] sm:$0xff] %v2695_v18 }
 0x5e4   :  { %2958 = vst [vmem:[%s4992_s5 + $0x178] sm:$0xff] %v2697_v57  ;;  %2960 = vst [vmem:[%s4992_s5 + $0x188] sm:$0xff] %v2699_v13 }
 0x5e5   :  { %2962 = vst [vmem:[%s4992_s5 + $0x198] sm:$0xff] %v2701_v52  ;;  %2964 = vst [vmem:[%s4992_s5 + $0x1a8] sm:$0xff] %v2703_v30 }
 0x5e6   :  { %2966 = vst [vmem:[%s4992_s5 + $0x1b8] sm:$0xff] %v2705_v44  ;;  %2968 = vst [vmem:[%s4992_s5 + $0x1c8] sm:$0xff] %v2707_v25 }
 0x5e7   :  { %2970 = vst [vmem:[%s4992_s5 + $0x1d8] sm:$0xff] %v2709_v26  ;;  %2972 = vst [vmem:[%s4992_s5 + $0x1e8] sm:$0xff] %v2711_v48 }
 0x5e8   :  { %2974 = vst [vmem:[%s4992_s5 + $0x1f8] sm:$0xff] %v2713_v24 }

</bundles_post_ra>
